<compile_context>
chip_gen: v7x
topology: tpu7x:2x2x1
jax: 0.10.0
libtpu: 0.0.40
codegen_flags: <defaults>
</compile_context>

<pallas_src>
import functools
import math

import jax
import jax.numpy as jnp
from jax.experimental import pallas as pl
from jax.experimental.pallas import tpu as pltpu

EPS = 1e-5
NEG_SLOPE = 0.3


def _round_up(a, b):
    return ((a + b - 1) // b) * b


# ---------------------------------------------------------------------------
# Pallas kernels
# ---------------------------------------------------------------------------
def _deconv_matmul_kernel(p_ref, w_ref, o_ref):
    # (TM, Cin*Kc^2) bf16 @ (Cin*Kc^2, s*s*Cout) bf16 -> f32 on the MXU.
    o_ref[...] = jnp.dot(p_ref[...], w_ref[...],
                         preferred_element_type=jnp.float32)


def _bn_stats_kernel(y_ref, sum_ref, sq_ref):
    # Accumulate per-lane sum / sum-of-squares across the ("arbitrary") grid axis.
    @pl.when(pl.program_id(0) == 0)
    def _init():
        sum_ref[...] = jnp.zeros_like(sum_ref)
        sq_ref[...] = jnp.zeros_like(sq_ref)

    y = y_ref[...]
    sum_ref[...] += jnp.sum(y, axis=0, keepdims=True)
    sq_ref[...] += jnp.sum(y * y, axis=0, keepdims=True)


def _bn_apply_lrelu_kernel(y_ref, scale_ref, shift_ref, o_ref):
    # Per-lane (channel-tiled) affine + LeakyReLU(0.3) on lane-dense (TR, L) blocks.
    y = y_ref[...] * scale_ref[...] + shift_ref[...]
    o_ref[...] = jnp.where(y > 0, y, NEG_SLOPE * y).astype(o_ref.dtype)


# ---------------------------------------------------------------------------
# Pallas wrappers
# ---------------------------------------------------------------------------
def _pallas_deconv_matmul(patches, w_big):
    """(M, CK) bf16 @ (CK, NC) bf16 -> (M, NC) f32, tiled over M."""
    M, CK = patches.shape
    _, NC = w_big.shape
    n_tiles = -(-M // 512)                               # aim for <=512-row tiles
    TM = min(512, _round_up(-(-M // n_tiles), 128))      # 128-aligned row tile
    Mp = _round_up(M, TM)
    if Mp != M:
        patches = jnp.pad(patches, ((0, Mp - M), (0, 0)))
    out = pl.pallas_call(
        _deconv_matmul_kernel,
        out_shape=jax.ShapeDtypeStruct((Mp, NC), jnp.float32),
        grid=(Mp // TM,),
        in_specs=[
            pl.BlockSpec((TM, CK), lambda i: (i, 0)),   # row tiles of patches
            pl.BlockSpec((CK, NC), lambda i: (0, 0)),   # weight resident
        ],
        out_specs=pl.BlockSpec((TM, NC), lambda i: (i, 0)),
        compiler_params=pltpu.CompilerParams(
            dimension_semantics=("parallel",)),
    )(patches, w_big)
    return out[:M]


def _batchnorm_lrelu(y, gamma, beta, out_dtype):
    """Training-mode BatchNorm2d (biased variance, eps=1e-5) + LeakyReLU(0.3).

    Works on a lane-dense (rows, L) view of the NHWC tensor, L = lcm(C, 128),
    so stores use full 128-lane vregs instead of 3-8 lanes of 128. `out_dtype`
    is bf16 for intermediate layers (next layer consumes bf16) and f32 for the
    final layer.
    """
    N, OH, OW, C = y.shape
    Mtot = N * OH * OW
    g = 128 // math.gcd(C, 128)
    L = C * g
    if L > 4096:               # pathological channel counts: lane-sparse fallback
        g, L = 1, C

    T = Mtot * C
    R = -(-T // L)
    TR = min(256, max(16, _round_up(max(R // 4, 1), 16)))   # 16-aligned (bf16 ok)
    Rp = _round_up(R, TR)
    flat = y.reshape(T)
    if Rp * L != T:
        flat = jnp.pad(flat, (0, Rp * L - T))   # zero pad: no effect on sums
    y2 = flat.reshape(Rp, L)

    # Pass 1: per-lane sum / sum-of-squares, accumulated across the grid.
    lane_sum, lane_sq = pl.pallas_call(
        _bn_stats_kernel,
        out_shape=(jax.ShapeDtypeStruct((1, L), jnp.float32),
                   jax.ShapeDtypeStruct((1, L), jnp.float32)),
        grid=(Rp // TR,),
        in_specs=[pl.BlockSpec((TR, L), lambda i: (i, 0))],
        out_specs=(pl.BlockSpec((1, L), lambda i: (0, 0)),
                   pl.BlockSpec((1, L), lambda i: (0, 0))),
        compiler_params=pltpu.CompilerParams(
            dimension_semantics=("arbitrary",)),
    )(y2)

    # Tiny JAX fold: lane l corresponds to channel l % C.
    ch_sum = lane_sum.reshape(g, C).sum(axis=0)
    ch_sq = lane_sq.reshape(g, C).sum(axis=0)
    mean = ch_sum / Mtot
    var = jnp.maximum(ch_sq / Mtot - mean * mean, 0.0)   # biased variance
    inv = jax.lax.rsqrt(var + EPS)
    scale = gamma * inv
    shift = beta - mean * scale
    scale_l = jnp.tile(scale, g).reshape(1, L)
    shift_l = jnp.tile(shift, g).reshape(1, L)

    # Pass 2: normalize + LeakyReLU, lane-dense, parallel over row tiles.
    out = pl.pallas_call(
        _bn_apply_lrelu_kernel,
        out_shape=jax.ShapeDtypeStruct((Rp, L), out_dtype),
        grid=(Rp // TR,),
        in_specs=[pl.BlockSpec((TR, L), lambda i: (i, 0)),
                  pl.BlockSpec((1, L), lambda i: (0, 0)),
                  pl.BlockSpec((1, L), lambda i: (0, 0))],
        out_specs=pl.BlockSpec((TR, L), lambda i: (i, 0)),
        compiler_params=pltpu.CompilerParams(
            dimension_semantics=("parallel",)),
    )(y2, scale_l, shift_l)

    return out.reshape(Rp * L)[:T].reshape(N, OH, OW, C)


# ---------------------------------------------------------------------------
# One layer: ConvTranspose2d (phase decomposition) + BatchNorm2d + LeakyReLU
# ---------------------------------------------------------------------------
def conv_transpose_bn_lrelu(x, w, gamma, beta, stride, padding, out_dtype):
    """x: NHWC (f32 or bf16). w: (Cin, Cout, K, K) PyTorch ConvTranspose2d layout."""
    N, H, W_in, Cin = x.shape
    _, Cout, K, _ = w.shape
    s = stride
    Kc = -(-K // s)                     # ceil(K / s): per-phase sub-kernel extent
    U = H + Kc - 1                      # output "super-pixel" rows (pre-crop)
    V = W_in + Kc - 1
    OH = (H - 1) * s + K - 2 * padding
    OW = (W_in - 1) * s + K - 2 * padding

    # Phase-combined weight: rows ordered (jh, jw, ci), cols ordered (r, c, co).
    # out_full[n, u*s+r, v*s+c, co] = sum_{jh,jw,ci} x_pad[n,u+jh,v+jw,ci] * W[...]
    # with kernel tap kh = r + s*(Kc-1-jh), kw = c + s*(Kc-1-jw) (zero if >= K).
    row_blocks = []
    for jh in range(Kc):
        for jw in range(Kc):
            col_blocks = []
            for r in range(s):
                for c in range(s):
                    kh = r + s * (Kc - 1 - jh)
                    kw = c + s * (Kc - 1 - jw)
                    if kh < K and kw < K:
                        col_blocks.append(w[:, :, kh, kw])
                    else:
                        col_blocks.append(jnp.zeros((Cin, Cout), w.dtype))
            row_blocks.append(jnp.concatenate(col_blocks, axis=1))
    w_big = jnp.concatenate(row_blocks, axis=0).astype(jnp.bfloat16)

    # im2col over Kc x Kc patches (bf16); contraction dim = Cin * Kc^2.
    xb = x.astype(jnp.bfloat16)
    xp = jnp.pad(xb, ((0, 0), (Kc - 1, Kc - 1), (Kc - 1, Kc - 1), (0, 0)))
    pieces = [xp[:, jh:jh + U, jw:jw + V, :]
              for jh in range(Kc) for jw in range(Kc)]
    patches = jnp.concatenate(pieces, axis=-1).reshape(N * U * V, Kc * Kc * Cin)

    # One big MXU matmul produces all s*s output phases at once.
    out = _pallas_deconv_matmul(patches, w_big)          # (N*U*V, s*s*Cout) f32

    # Pixel shuffle (phase interleave) + padding crop (pure layout plumbing).
    out = out.reshape(N, U, V, s, s, Cout)
    out = jnp.transpose(out, (0, 1, 3, 2, 4, 5)).reshape(N, U * s, V * s, Cout)
    out = out[:, padding:padding + OH, padding:padding + OW, :]

    # ConvTranspose2d bias intentionally not added: BN mean subtraction cancels
    # a per-channel constant exactly and the variance is unchanged.
    return _batchnorm_lrelu(out, gamma, beta, out_dtype)


# ---------------------------------------------------------------------------
# DecByLayer equivalent
# ---------------------------------------------------------------------------
def dec_by_layer_init(key, ncvs, ksizes):
    """Deterministic synthetic params (PyTorch-like shapes / default BN affine)."""
    params = []
    for i, k in enumerate(ksizes):
        key, wk, bk = jax.random.split(key, 3)
        cin, cout = ncvs[i], ncvs[i + 1]
        bound = 1.0 / math.sqrt(cout * k * k)
        w = jax.random.uniform(wk, (cin, cout, k, k), jnp.float32, -bound, bound)
        b = jax.random.uniform(bk, (cout,), jnp.float32, -bound, bound)  # unused (BN cancels it)
        gamma = jnp.ones((cout,), jnp.float32)   # BatchNorm2d default weight
        beta = jnp.zeros((cout,), jnp.float32)   # BatchNorm2d default bias
        params.append((w, b, gamma, beta))
    return params


def dec_by_layer_apply(params, strides, paddings, x_nchw):
    x = jnp.transpose(x_nchw, (0, 2, 3, 1))              # NCHW -> NHWC once
    n_layers = len(params)
    for li, ((w, _b, gamma, beta), s, p) in enumerate(zip(params, strides, paddings)):
        # Intermediate activations in bf16 (next layer's matmul input dtype),
        # final layer in f32.
        out_dtype = jnp.float32 if li == n_layers - 1 else jnp.bfloat16
        x = conv_transpose_bn_lrelu(x, w, gamma, beta, s, p, out_dtype)
    return jnp.transpose(x, (0, 3, 1, 2))                # NHWC -> NCHW once


# ---------------------------------------------------------------------------
# Pure-JAX reference (direct scatter-add ConvTranspose2d + train-mode BN)
# ---------------------------------------------------------------------------
def _reference_forward(params, strides, paddings, x_nchw):
    x = jnp.transpose(x_nchw, (0, 2, 3, 1)).astype(jnp.float32)
    for (w, _b, gamma, beta), s, p in zip(params, strides, paddings):
        N, H, Wd, Cin = x.shape
        _, Cout, K, _ = w.shape
        part = (x.reshape(N * H * Wd, Cin) @ w.reshape(Cin, Cout * K * K))
        part = part.reshape(N, H, Wd, Cout, K, K)
        OHf = (H - 1) * s + K
        OWf = (Wd - 1) * s + K
        full = jnp.zeros((N, OHf, OWf, Cout), jnp.float32)
        for kh in range(K):
            for kw in range(K):
                full = full.at[:, kh:kh + (H - 1) * s + 1:s,
                               kw:kw + (Wd - 1) * s + 1:s, :].add(part[..., kh, kw])
        OH, OW = OHf - 2 * p, OWf - 2 * p
        out = full[:, p:p + OH, p:p + OW, :]
        mean = out.mean(axis=(0, 1, 2))
        var = ((out - mean) ** 2).mean(axis=(0, 1, 2))
        y = (out - mean) * jax.lax.rsqrt(var + EPS) * gamma + beta
        x = jnp.where(y > 0, y, NEG_SLOPE * y)
    return jnp.transpose(x, (0, 3, 1, 2))


if __name__ == "__main__":
    # DecByLayer(ncvs=[4, 8, 3], ksizes=[4, 4], strides=[2, 2], paddings=[1, 1],
    #            show_shapes=False)
    ncvs = [4, 8, 3]
    ksizes = [4, 4]
    strides = [2, 2]
    paddings = [1, 1]

    key = jax.random.PRNGKey(0)
    key, xk = jax.random.split(key)
    x = jax.random.normal(xk, (2, 4, 8, 8), jnp.float32)   # NCHW

    params = dec_by_layer_init(key, ncvs, ksizes)
    fwd = jax.jit(functools.partial(dec_by_layer_apply, params, strides, paddings))
    out = fwd(x)
    jax.block_until_ready(out)

    # (2,4,8,8) -> (2,8,16,16) -> (2,3,32,32)
    assert out.shape == (2, 3, 32, 32), out.shape
    assert out.dtype == jnp.float32

    # Numerical sanity check vs. a pure-JAX reference (loose tolerance because
    # the Pallas path uses bf16 matmul operands / bf16 inter-layer activations
    # with f32 accumulation).
    ref = _reference_forward(params, strides, paddings, x)
    err = float(jnp.max(jnp.abs(out - ref) / (1.0 + jnp.abs(ref))))
    assert err < 0.15, f"mismatch vs reference: max scaled error {err}"

    print("KERNEL_OK")
</pallas_src>

<mosaic_0001>
module attributes {stable_mosaic.version = 11 : i64} {
  func.func @_deconv_matmul_kernel(%arg0: i32, %arg1: memref<256x16xbf16, #tpu.memory_space<vmem>>, %arg2: memref<16x32xbf16, #tpu.memory_space<vmem>>, %arg3: memref<256x32xf32, #tpu.memory_space<vmem>>) attributes {dimension_semantics = [#tpu.dimension_semantics<parallel>], iteration_bounds = array<i64: 1>, scalar_prefetch = 0 : i64, scratch_operands = 0 : i64, tpu.core_type = #tpu.core_type<tc>, window_params = [{transform_indices = @transform_0, window_bounds = array<i64: 256, 16>}, {pipeline_mode = #tpu.pipeline_mode<synchronous>, transform_indices = @transform_1, window_bounds = array<i64: 16, 32>}, {transform_indices = @transform_2, window_bounds = array<i64: 256, 32>}]} {
    %c0 = arith.constant 0 : index
    %c0_0 = arith.constant 0 : index
    %0 = vector.load %arg1[%c0, %c0_0] : memref<256x16xbf16, #tpu.memory_space<vmem>>, vector<256x16xbf16>
    %c0_1 = arith.constant 0 : index
    %c0_2 = arith.constant 0 : index
    %1 = vector.load %arg2[%c0_1, %c0_2] : memref<16x32xbf16, #tpu.memory_space<vmem>>, vector<16x32xbf16>
    %cst = arith.constant dense<0.000000e+00> : vector<256x32xf32>
    %2 = tpu.matmul %0, %1, %cst {dimension_numbers = #tpu.dot_dimension_numbers<[1], [0], [0], [1], [0, 0, 1, 1], [], []>} : vector<256x16xbf16>, vector<16x32xbf16>, vector<256x32xf32> -> vector<256x32xf32>
    %c0_3 = arith.constant 0 : index
    %c0_4 = arith.constant 0 : index
    %3 = vector.load %arg3[%c0_3, %c0_4] : memref<256x32xf32, #tpu.memory_space<vmem>>, vector<256x32xf32>
    tpu.vector_store %arg3[%c0_3, %c0_4], %2 {strides = array<i32>} : memref<256x32xf32, #tpu.memory_space<vmem>>, vector<256x32xf32>,
    return
  }
  func.func @transform_0(%arg0: i32) -> (i32, i32) {
    %c0_i32 = arith.constant 0 : i32
    %c0_i32_0 = arith.constant 0 : i32
    return %arg0, %c0_i32 : i32, i32
  }
  func.func @transform_1(%arg0: i32) -> (i32, i32) {
    %c0_i32 = arith.constant 0 : i32
    %c0_i32_0 = arith.constant 0 : i32
    %c0_i32_1 = arith.constant 0 : i32
    return %c0_i32, %c0_i32_0 : i32, i32
  }
  func.func @transform_2(%arg0: i32) -> (i32, i32) {
    %c0_i32 = arith.constant 0 : i32
    %c0_i32_0 = arith.constant 0 : i32
    return %arg0, %c0_i32 : i32, i32
  }
}

module attributes {stable_mosaic.version = 11 : i64} {
  func.func @_bn_stats_kernel(%arg0: i32, %arg1: memref<16x128xf32, #tpu.memory_space<vmem>>, %arg2: memref<1x128xf32, #tpu.memory_space<vmem>>, %arg3: memref<1x128xf32, #tpu.memory_space<vmem>>) attributes {dimension_semantics = [#tpu.dimension_semantics<arbitrary>], iteration_bounds = array<i64: 2>, scalar_prefetch = 0 : i64, scratch_operands = 0 : i64, tpu.core_type = #tpu.core_type<tc>, window_params = [{transform_indices = @transform_0, window_bounds = array<i64: 16, 128>}, {pipeline_mode = #tpu.pipeline_mode<synchronous>, transform_indices = @transform_1, window_bounds = array<i64: 1, 128>}, {pipeline_mode = #tpu.pipeline_mode<synchronous>, transform_indices = @transform_2, window_bounds = array<i64: 1, 128>}]} {
    %c0_i32 = arith.constant 0 : i32
    %0 = arith.cmpi eq, %arg0, %c0_i32 : i32
    %1 = arith.extui %0 : i1 to i32
    %c0_i32_0 = arith.constant 0 : i32
    %2 = arith.cmpi ne, %1, %c0_i32_0 : i32
    scf.if %2 {
      %cst_11 = arith.constant 0.000000e+00 : f32
      %15 = vector.broadcast %cst_11 : f32 to vector<1x128xf32>
      %c0_12 = arith.constant 0 : index
      %c0_13 = arith.constant 0 : index
      %16 = vector.load %arg2[%c0_12, %c0_13] : memref<1x128xf32, #tpu.memory_space<vmem>>, vector<1x128xf32>
      tpu.vector_store %arg2[%c0_12, %c0_13], %15 {strides = array<i32>} : memref<1x128xf32, #tpu.memory_space<vmem>>, vector<1x128xf32>,
      %cst_14 = arith.constant 0.000000e+00 : f32
      %17 = vector.broadcast %cst_14 : f32 to vector<1x128xf32>
      %c0_15 = arith.constant 0 : index
      %c0_16 = arith.constant 0 : index
      %18 = vector.load %arg3[%c0_15, %c0_16] : memref<1x128xf32, #tpu.memory_space<vmem>>, vector<1x128xf32>
      tpu.vector_store %arg3[%c0_15, %c0_16], %17 {strides = array<i32>} : memref<1x128xf32, #tpu.memory_space<vmem>>, vector<1x128xf32>,
    } else {
    }
    %c0 = arith.constant 0 : index
    %c0_1 = arith.constant 0 : index
    %3 = vector.load %arg1[%c0, %c0_1] : memref<16x128xf32, #tpu.memory_space<vmem>>, vector<16x128xf32>
    %c0_2 = arith.constant 0 : index
    %c0_3 = arith.constant 0 : index
    %4 = vector.load %arg2[%c0_2, %c0_3] : memref<1x128xf32, #tpu.memory_space<vmem>>, vector<1x128xf32>
    %cst = arith.constant dense<0.000000e+00> : vector<128xf32>
    %5 = vector.multi_reduction <add>, %3, %cst [0] : vector<16x128xf32> to vector<128xf32>
    %6 = vector.shape_cast %5 : vector<128xf32> to vector<1x128xf32>
    %7 = arith.addf %4, %6 : vector<1x128xf32>
    %c0_4 = arith.constant 0 : index
    %c0_5 = arith.constant 0 : index
    %8 = vector.load %arg2[%c0_4, %c0_5] : memref<1x128xf32, #tpu.memory_space<vmem>>, vector<1x128xf32>
    tpu.vector_store %arg2[%c0_4, %c0_5], %7 {strides = array<i32>} : memref<1x128xf32, #tpu.memory_space<vmem>>, vector<1x128xf32>,
    %c0_6 = arith.constant 0 : index
    %c0_7 = arith.constant 0 : index
    %9 = vector.load %arg3[%c0_6, %c0_7] : memref<1x128xf32, #tpu.memory_space<vmem>>, vector<1x128xf32>
    %10 = arith.mulf %3, %3 : vector<16x128xf32>
    %cst_8 = arith.constant dense<0.000000e+00> : vector<128xf32>
    %11 = vector.multi_reduction <add>, %10, %cst_8 [0] : vector<16x128xf32> to vector<128xf32>
    %12 = vector.shape_cast %11 : vector<128xf32> to vector<1x128xf32>
    %13 = arith.addf %9, %12 : vector<1x128xf32>
    %c0_9 = arith.constant 0 : index
    %c0_10 = arith.constant 0 : index
    %14 = vector.load %arg3[%c0_9, %c0_10] : memref<1x128xf32, #tpu.memory_space<vmem>>, vector<1x128xf32>
    tpu.vector_store %arg3[%c0_9, %c0_10], %13 {strides = array<i32>} : memref<1x128xf32, #tpu.memory_space<vmem>>, vector<1x128xf32>,
    return
  }
  func.func @transform_0(%arg0: i32) -> (i32, i32) {
    %c0_i32 = arith.constant 0 : i32
    %c0_i32_0 = arith.constant 0 : i32
    return %arg0, %c0_i32 : i32, i32
  }
  func.func @transform_1(%arg0: i32) -> (i32, i32) {
    %c0_i32 = arith.constant 0 : i32
    %c0_i32_0 = arith.constant 0 : i32
    %c0_i32_1 = arith.constant 0 : i32
    return %c0_i32, %c0_i32_0 : i32, i32
  }
  func.func @transform_2(%arg0: i32) -> (i32, i32) {
    %c0_i32 = arith.constant 0 : i32
    %c0_i32_0 = arith.constant 0 : i32
    %c0_i32_1 = arith.constant 0 : i32
    return %c0_i32, %c0_i32_0 : i32, i32
  }
}

module attributes {stable_mosaic.version = 11 : i64} {
  func.func @_bn_apply_lrelu_kernel(%arg0: i32, %arg1: memref<16x128xf32, #tpu.memory_space<vmem>>, %arg2: memref<1x128xf32, #tpu.memory_space<vmem>>, %arg3: memref<1x128xf32, #tpu.memory_space<vmem>>, %arg4: memref<16x128xbf16, #tpu.memory_space<vmem>>) attributes {dimension_semantics = [#tpu.dimension_semantics<parallel>], iteration_bounds = array<i64: 2>, scalar_prefetch = 0 : i64, scratch_operands = 0 : i64, tpu.core_type = #tpu.core_type<tc>, window_params = [{transform_indices = @transform_0, window_bounds = array<i64: 16, 128>}, {pipeline_mode = #tpu.pipeline_mode<synchronous>, transform_indices = @transform_1, window_bounds = array<i64: 1, 128>}, {pipeline_mode = #tpu.pipeline_mode<synchronous>, transform_indices = @transform_2, window_bounds = array<i64: 1, 128>}, {transform_indices = @transform_3, window_bounds = array<i64: 16, 128>}]} {
    %c0 = arith.constant 0 : index
    %c0_0 = arith.constant 0 : index
    %0 = vector.load %arg1[%c0, %c0_0] : memref<16x128xf32, #tpu.memory_space<vmem>>, vector<16x128xf32>
    %c0_1 = arith.constant 0 : index
    %c0_2 = arith.constant 0 : index
    %1 = vector.load %arg2[%c0_1, %c0_2] : memref<1x128xf32, #tpu.memory_space<vmem>>, vector<1x128xf32>
    %2 = vector.broadcast %1 : vector<1x128xf32> to vector<16x128xf32>
    %3 = arith.mulf %0, %2 : vector<16x128xf32>
    %c0_3 = arith.constant 0 : index
    %c0_4 = arith.constant 0 : index
    %4 = vector.load %arg3[%c0_3, %c0_4] : memref<1x128xf32, #tpu.memory_space<vmem>>, vector<1x128xf32>
    %5 = vector.broadcast %4 : vector<1x128xf32> to vector<16x128xf32>
    %6 = arith.addf %3, %5 : vector<16x128xf32>
    %cst = arith.constant 0.000000e+00 : f32
    %7 = vector.broadcast %cst : f32 to vector<16x128xf32>
    %8 = arith.cmpf ogt, %6, %7 : vector<16x128xf32>
    %cst_5 = arith.constant 3.000000e-01 : f32
    %9 = vector.broadcast %cst_5 : f32 to vector<16x128xf32>
    %10 = arith.mulf %9, %6 : vector<16x128xf32>
    %11 = arith.select %8, %6, %10 : vector<16x128xi1>, vector<16x128xf32>
    %12 = arith.truncf %11 : vector<16x128xf32> to vector<16x128xbf16>
    %c0_6 = arith.constant 0 : index
    %c0_7 = arith.constant 0 : index
    %13 = vector.load %arg4[%c0_6, %c0_7] : memref<16x128xbf16, #tpu.memory_space<vmem>>, vector<16x128xbf16>
    tpu.vector_store %arg4[%c0_6, %c0_7], %12 {strides = array<i32>} : memref<16x128xbf16, #tpu.memory_space<vmem>>, vector<16x128xbf16>,
    return
  }
  func.func @transform_0(%arg0: i32) -> (i32, i32) {
    %c0_i32 = arith.constant 0 : i32
    %c0_i32_0 = arith.constant 0 : i32
    return %arg0, %c0_i32 : i32, i32
  }
  func.func @transform_1(%arg0: i32) -> (i32, i32) {
    %c0_i32 = arith.constant 0 : i32
    %c0_i32_0 = arith.constant 0 : i32
    %c0_i32_1 = arith.constant 0 : i32
    return %c0_i32, %c0_i32_0 : i32, i32
  }
  func.func @transform_2(%arg0: i32) -> (i32, i32) {
    %c0_i32 = arith.constant 0 : i32
    %c0_i32_0 = arith.constant 0 : i32
    %c0_i32_1 = arith.constant 0 : i32
    return %c0_i32, %c0_i32_0 : i32, i32
  }
  func.func @transform_3(%arg0: i32) -> (i32, i32) {
    %c0_i32 = arith.constant 0 : i32
    %c0_i32_0 = arith.constant 0 : i32
    return %arg0, %c0_i32 : i32, i32
  }
}

module attributes {stable_mosaic.version = 11 : i64} {
  func.func @_deconv_matmul_kernel(%arg0: i32, %arg1: memref<384x32xbf16, #tpu.memory_space<vmem>>, %arg2: memref<32x12xbf16, #tpu.memory_space<vmem>>, %arg3: memref<384x12xf32, #tpu.memory_space<vmem>>) attributes {dimension_semantics = [#tpu.dimension_semantics<parallel>], iteration_bounds = array<i64: 2>, scalar_prefetch = 0 : i64, scratch_operands = 0 : i64, tpu.core_type = #tpu.core_type<tc>, window_params = [{transform_indices = @transform_0, window_bounds = array<i64: 384, 32>}, {pipeline_mode = #tpu.pipeline_mode<synchronous>, transform_indices = @transform_1, window_bounds = array<i64: 32, 12>}, {transform_indices = @transform_2, window_bounds = array<i64: 384, 12>}]} {
    %c0 = arith.constant 0 : index
    %c0_0 = arith.constant 0 : index
    %0 = vector.load %arg1[%c0, %c0_0] : memref<384x32xbf16, #tpu.memory_space<vmem>>, vector<384x32xbf16>
    %c0_1 = arith.constant 0 : index
    %c0_2 = arith.constant 0 : index
    %1 = vector.load %arg2[%c0_1, %c0_2] : memref<32x12xbf16, #tpu.memory_space<vmem>>, vector<32x12xbf16>
    %cst = arith.constant dense<0.000000e+00> : vector<384x12xf32>
    %2 = tpu.matmul %0, %1, %cst {dimension_numbers = #tpu.dot_dimension_numbers<[1], [0], [0], [1], [0, 0, 1, 1], [], []>} : vector<384x32xbf16>, vector<32x12xbf16>, vector<384x12xf32> -> vector<384x12xf32>
    %c0_3 = arith.constant 0 : index
    %c0_4 = arith.constant 0 : index
    %3 = vector.load %arg3[%c0_3, %c0_4] : memref<384x12xf32, #tpu.memory_space<vmem>>, vector<384x12xf32>
    tpu.vector_store %arg3[%c0_3, %c0_4], %2 {strides = array<i32>} : memref<384x12xf32, #tpu.memory_space<vmem>>, vector<384x12xf32>,
    return
  }
  func.func @transform_0(%arg0: i32) -> (i32, i32) {
    %c0_i32 = arith.constant 0 : i32
    %c0_i32_0 = arith.constant 0 : i32
    return %arg0, %c0_i32 : i32, i32
  }
  func.func @transform_1(%arg0: i32) -> (i32, i32) {
    %c0_i32 = arith.constant 0 : i32
    %c0_i32_0 = arith.constant 0 : i32
    %c0_i32_1 = arith.constant 0 : i32
    return %c0_i32, %c0_i32_0 : i32, i32
  }
  func.func @transform_2(%arg0: i32) -> (i32, i32) {
    %c0_i32 = arith.constant 0 : i32
    %c0_i32_0 = arith.constant 0 : i32
    return %arg0, %c0_i32 : i32, i32
  }
}

module attributes {stable_mosaic.version = 11 : i64} {
  func.func @_bn_stats_kernel(%arg0: i32, %arg1: memref<16x384xf32, #tpu.memory_space<vmem>>, %arg2: memref<1x384xf32, #tpu.memory_space<vmem>>, %arg3: memref<1x384xf32, #tpu.memory_space<vmem>>) attributes {dimension_semantics = [#tpu.dimension_semantics<arbitrary>], iteration_bounds = array<i64: 1>, scalar_prefetch = 0 : i64, scratch_operands = 0 : i64, tpu.core_type = #tpu.core_type<tc>, window_params = [{transform_indices = @transform_0, window_bounds = array<i64: 16, 384>}, {pipeline_mode = #tpu.pipeline_mode<synchronous>, transform_indices = @transform_1, window_bounds = array<i64: 1, 384>}, {pipeline_mode = #tpu.pipeline_mode<synchronous>, transform_indices = @transform_2, window_bounds = array<i64: 1, 384>}]} {
    %c0_i32 = arith.constant 0 : i32
    %0 = arith.cmpi eq, %arg0, %c0_i32 : i32
    %1 = arith.extui %0 : i1 to i32
    %c0_i32_0 = arith.constant 0 : i32
    %2 = arith.cmpi ne, %1, %c0_i32_0 : i32
    scf.if %2 {
      %cst_11 = arith.constant 0.000000e+00 : f32
      %15 = vector.broadcast %cst_11 : f32 to vector<1x384xf32>
      %c0_12 = arith.constant 0 : index
      %c0_13 = arith.constant 0 : index
      %16 = vector.load %arg2[%c0_12, %c0_13] : memref<1x384xf32, #tpu.memory_space<vmem>>, vector<1x384xf32>
      tpu.vector_store %arg2[%c0_12, %c0_13], %15 {strides = array<i32>} : memref<1x384xf32, #tpu.memory_space<vmem>>, vector<1x384xf32>,
      %cst_14 = arith.constant 0.000000e+00 : f32
      %17 = vector.broadcast %cst_14 : f32 to vector<1x384xf32>
      %c0_15 = arith.constant 0 : index
      %c0_16 = arith.constant 0 : index
      %18 = vector.load %arg3[%c0_15, %c0_16] : memref<1x384xf32, #tpu.memory_space<vmem>>, vector<1x384xf32>
      tpu.vector_store %arg3[%c0_15, %c0_16], %17 {strides = array<i32>} : memref<1x384xf32, #tpu.memory_space<vmem>>, vector<1x384xf32>,
    } else {
    }
    %c0 = arith.constant 0 : index
    %c0_1 = arith.constant 0 : index
    %3 = vector.load %arg1[%c0, %c0_1] : memref<16x384xf32, #tpu.memory_space<vmem>>, vector<16x384xf32>
    %c0_2 = arith.constant 0 : index
    %c0_3 = arith.constant 0 : index
    %4 = vector.load %arg2[%c0_2, %c0_3] : memref<1x384xf32, #tpu.memory_space<vmem>>, vector<1x384xf32>
    %cst = arith.constant dense<0.000000e+00> : vector<384xf32>
    %5 = vector.multi_reduction <add>, %3, %cst [0] : vector<16x384xf32> to vector<384xf32>
    %6 = vector.shape_cast %5 : vector<384xf32> to vector<1x384xf32>
    %7 = arith.addf %4, %6 : vector<1x384xf32>
    %c0_4 = arith.constant 0 : index
    %c0_5 = arith.constant 0 : index
    %8 = vector.load %arg2[%c0_4, %c0_5] : memref<1x384xf32, #tpu.memory_space<vmem>>, vector<1x384xf32>
    tpu.vector_store %arg2[%c0_4, %c0_5], %7 {strides = array<i32>} : memref<1x384xf32, #tpu.memory_space<vmem>>, vector<1x384xf32>,
    %c0_6 = arith.constant 0 : index
    %c0_7 = arith.constant 0 : index
    %9 = vector.load %arg3[%c0_6, %c0_7] : memref<1x384xf32, #tpu.memory_space<vmem>>, vector<1x384xf32>
    %10 = arith.mulf %3, %3 : vector<16x384xf32>
    %cst_8 = arith.constant dense<0.000000e+00> : vector<384xf32>
    %11 = vector.multi_reduction <add>, %10, %cst_8 [0] : vector<16x384xf32> to vector<384xf32>
    %12 = vector.shape_cast %11 : vector<384xf32> to vector<1x384xf32>
    %13 = arith.addf %9, %12 : vector<1x384xf32>
    %c0_9 = arith.constant 0 : index
    %c0_10 = arith.constant 0 : index
    %14 = vector.load %arg3[%c0_9, %c0_10] : memref<1x384xf32, #tpu.memory_space<vmem>>, vector<1x384xf32>
    tpu.vector_store %arg3[%c0_9, %c0_10], %13 {strides = array<i32>} : memref<1x384xf32, #tpu.memory_space<vmem>>, vector<1x384xf32>,
    return
  }
  func.func @transform_0(%arg0: i32) -> (i32, i32) {
    %c0_i32 = arith.constant 0 : i32
    %c0_i32_0 = arith.constant 0 : i32
    return %arg0, %c0_i32 : i32, i32
  }
  func.func @transform_1(%arg0: i32) -> (i32, i32) {
    %c0_i32 = arith.constant 0 : i32
    %c0_i32_0 = arith.constant 0 : i32
    %c0_i32_1 = arith.constant 0 : i32
    return %c0_i32, %c0_i32_0 : i32, i32
  }
  func.func @transform_2(%arg0: i32) -> (i32, i32) {
    %c0_i32 = arith.constant 0 : i32
    %c0_i32_0 = arith.constant 0 : i32
    %c0_i32_1 = arith.constant 0 : i32
    return %c0_i32, %c0_i32_0 : i32, i32
  }
}

module attributes {stable_mosaic.version = 11 : i64} {
  func.func @_bn_apply_lrelu_kernel(%arg0: i32, %arg1: memref<16x384xf32, #tpu.memory_space<vmem>>, %arg2: memref<1x384xf32, #tpu.memory_space<vmem>>, %arg3: memref<1x384xf32, #tpu.memory_space<vmem>>, %arg4: memref<16x384xf32, #tpu.memory_space<vmem>>) attributes {dimension_semantics = [#tpu.dimension_semantics<parallel>], iteration_bounds = array<i64: 1>, scalar_prefetch = 0 : i64, scratch_operands = 0 : i64, tpu.core_type = #tpu.core_type<tc>, window_params = [{transform_indices = @transform_0, window_bounds = array<i64: 16, 384>}, {pipeline_mode = #tpu.pipeline_mode<synchronous>, transform_indices = @transform_1, window_bounds = array<i64: 1, 384>}, {pipeline_mode = #tpu.pipeline_mode<synchronous>, transform_indices = @transform_2, window_bounds = array<i64: 1, 384>}, {transform_indices = @transform_3, window_bounds = array<i64: 16, 384>}]} {
    %c0 = arith.constant 0 : index
    %c0_0 = arith.constant 0 : index
    %0 = vector.load %arg1[%c0, %c0_0] : memref<16x384xf32, #tpu.memory_space<vmem>>, vector<16x384xf32>
    %c0_1 = arith.constant 0 : index
    %c0_2 = arith.constant 0 : index
    %1 = vector.load %arg2[%c0_1, %c0_2] : memref<1x384xf32, #tpu.memory_space<vmem>>, vector<1x384xf32>
    %2 = vector.broadcast %1 : vector<1x384xf32> to vector<16x384xf32>
    %3 = arith.mulf %0, %2 : vector<16x384xf32>
    %c0_3 = arith.constant 0 : index
    %c0_4 = arith.constant 0 : index
    %4 = vector.load %arg3[%c0_3, %c0_4] : memref<1x384xf32, #tpu.memory_space<vmem>>, vector<1x384xf32>
    %5 = vector.broadcast %4 : vector<1x384xf32> to vector<16x384xf32>
    %6 = arith.addf %3, %5 : vector<16x384xf32>
    %cst = arith.constant 0.000000e+00 : f32
    %7 = vector.broadcast %cst : f32 to vector<16x384xf32>
    %8 = arith.cmpf ogt, %6, %7 : vector<16x384xf32>
    %cst_5 = arith.constant 3.000000e-01 : f32
    %9 = vector.broadcast %cst_5 : f32 to vector<16x384xf32>
    %10 = arith.mulf %9, %6 : vector<16x384xf32>
    %11 = arith.select %8, %6, %10 : vector<16x384xi1>, vector<16x384xf32>
    %c0_6 = arith.constant 0 : index
    %c0_7 = arith.constant 0 : index
    %12 = vector.load %arg4[%c0_6, %c0_7] : memref<16x384xf32, #tpu.memory_space<vmem>>, vector<16x384xf32>
    tpu.vector_store %arg4[%c0_6, %c0_7], %11 {strides = array<i32>} : memref<16x384xf32, #tpu.memory_space<vmem>>, vector<16x384xf32>,
    return
  }
  func.func @transform_0(%arg0: i32) -> (i32, i32) {
    %c0_i32 = arith.constant 0 : i32
    %c0_i32_0 = arith.constant 0 : i32
    return %arg0, %c0_i32 : i32, i32
  }
  func.func @transform_1(%arg0: i32) -> (i32, i32) {
    %c0_i32 = arith.constant 0 : i32
    %c0_i32_0 = arith.constant 0 : i32
    %c0_i32_1 = arith.constant 0 : i32
    return %c0_i32, %c0_i32_0 : i32, i32
  }
  func.func @transform_2(%arg0: i32) -> (i32, i32) {
    %c0_i32 = arith.constant 0 : i32
    %c0_i32_0 = arith.constant 0 : i32
    %c0_i32_1 = arith.constant 0 : i32
    return %c0_i32, %c0_i32_0 : i32, i32
  }
  func.func @transform_3(%arg0: i32) -> (i32, i32) {
    %c0_i32 = arith.constant 0 : i32
    %c0_i32_0 = arith.constant 0 : i32
    return %arg0, %c0_i32 : i32, i32
  }
}

</mosaic_0001>

<bundles_post_ra>
// kernel: dec_by_layer_apply.6
= control target key start
LH: loop header
LB: loop body
LE: loop exit
PB: predicated region body
PF: predicated region fallthrough
CT: control target
= control target key end

     0   :  { %7 = vsyncpa [#allocation3], 0  ;;  %s524_s9 = smov [#allocation2]   ;;  %s746_s0 = inlined_call_operand.vmem [shape: bf16[256,16], index: 0, kind: input, shape index: {}]   ;;  %s747_s1 = inlined_call_operand.hbm [shape: bf16[16,32], index: 1, kind: input, shape index: {}]   ;;  %s748_s2 = inlined_call_operand.vmem [shape: f32[256,32], index: 2, kind: output, shape index: {}]  }
   0x1   :  { %s15_s10 = sshll.u32 %s524_s9, 4  ;;  %s500_s13 = scalar_lea.hbm %s747_s1, 128  ;;  %s16_s10 = int_to_ptr.vmem [resolvable:$true] %s15_s10 }
   0x2   :  { %p501_p0 = scmp.ne.s32.totalorder %s747_s1, %s500_s13  ;;  %p504_p1 = scmp.lt.u32.totalorder %s500_s13, %s747_s1 }
   0x4   :  { %p506_p2 = pnand %p504_p1, %p501_p0 }
   0x6   :  { %509 = shalt.err (!%p506_p2)
}
   0x7   :  { %s510_s18 = scalar_lea.vmem %s16_s10, 128  ;;  %p515_p4 = scmp.lt.s32.totalorder %s16_s10, %s16_s10 }
   0x8   :  { %p511_p3 = scmp.ne.s32.totalorder %s16_s10, %s510_s18  ;;  %p516_p5 = scmp.lt.s32.totalorder %s510_s18, %s510_s18 }
   0xa   :  { %p517_p6 = por %p516_p5, %p515_p4 }
   0xc   :  { %p518_p7 = pnand %p517_p6, %p511_p3 }
   0xe   :  { %521 = shalt.err (!%p518_p7)
}
   0xf   :  { %s525_s19 = smov 64   ;;  %s526_s20 = smov 4  }
  0x10   :  { %21 = dma.hbm_to_vmem [thread:$0]  %s747_s1, 128, %s16_s10, [#allocation3], %s525_s19, %s525_s19, %s526_s20  }
  0x11   :  { %522 = dma.done.wait [#allocation3], 128  }
  0x12   :  { %523 = vsyncadd [#allocation3], 4294967168  ;;  %v483_v0 = vld [vmem:[#allocation2] sm:$0xff]   ;;  %vm146_vm0 = vcmask 130048   ;;  %v486_v3 = vld [vmem:[%s746_s0 + $0x8] sm:$0xff]   ;;  %vm356_vm1 = vcmask 261120  }
  0x13   :  { %v484_v1 = vld [vmem:[%s746_s0] sm:$0xff]   ;;  %444 = vmatprep.subr.bf16.mxu0 %v483_v0  ;;  %478 = vmatprep.subr.bf16.mxu1 %v483_v0  ;;  %v487_v4 = vld [vmem:[%s746_s0 + $0x48] sm:$0xff]   ;;  %v488_v5 = vld [vmem:[%s746_s0 + $0x10] sm:$0xff]  }
  0x14   :  { %v485_v2 = vld [vmem:[%s746_s0 + $0x40] sm:$0xff]   ;;  %445 = vmatpush3.bf16.msra.mxu0 %v483_v0  ;;  %479 = vmatpush3.bf16.msra.mxu1 %v483_v0  ;;  %v489_v6 = vld [vmem:[%s746_s0 + $0x50] sm:$0xff]   ;;  %v490_v7 = vld [vmem:[%s746_s0 + $0x18] sm:$0xff]  }
  0x15   :  { %446 = vmatprep.mubr.msk.bf16.mxu0 %vm146_vm0, %v484_v1  ;;  %462 = vmatprep.mubr.msk.bf16.mxu1 %vm146_vm0, %v485_v2  ;;  %v491_v8 = vld [vmem:[%s746_s0 + $0x58] sm:$0xff]   ;;  %v492_v9 = vld [vmem:[%s746_s0 + $0x20] sm:$0xff]   ;;  %v494_v11 = vld [vmem:[%s746_s0 + $0x28] sm:$0xff]  }
  0x16   :  { %v493_v10 = vld [vmem:[%s746_s0 + $0x60] sm:$0xff]   ;;  %v495_v12 = vld [vmem:[%s746_s0 + $0x68] sm:$0xff]   ;;  %v496_v13 = vld [vmem:[%s746_s0 + $0x30] sm:$0xff]  }
  0x17   :  { %447 = vmatmul.mubr.msk.bf16.vlgmr.msra.gmra.mrb[0].mxu0 %vm146_vm0, %v486_v3  ;;  %463 = vmatmul.mubr.msk.bf16.vlgmr.msra.gmra.mrb[0].mxu1 %vm146_vm0, %v487_v4  ;;  %v497_v14 = vld [vmem:[%s746_s0 + $0x70] sm:$0xff]   ;;  %v498_v15 = vld [vmem:[%s746_s0 + $0x38] sm:$0xff]  }
  0x18   :  { %450 = vmatprep.mubr.msk.bf16.mxu0 %vm146_vm0, %v488_v5  ;;  %466 = vmatprep.mubr.msk.bf16.mxu1 %vm146_vm0, %v489_v6  ;;  %v499_v16 = vld [vmem:[%s746_s0 + $0x78] sm:$0xff]  }
  0x1f   :  { %451 = vmatmul.mubr.msk.bf16.gmra.mrb[4].mxu0 %vm146_vm0, %v490_v7  ;;  %467 = vmatmul.mubr.msk.bf16.gmra.mrb[4].mxu1 %vm146_vm0, %v491_v8 }
  0x20   :  { %454 = vmatprep.mubr.msk.bf16.mxu0 %vm146_vm0, %v492_v9  ;;  %470 = vmatprep.mubr.msk.bf16.mxu1 %vm146_vm0, %v493_v10 }
  0x27   :  { %455 = vmatmul.mubr.msk.bf16.gmra.mrb[8].mxu0 %vm146_vm0, %v494_v11  ;;  %471 = vmatmul.mubr.msk.bf16.gmra.mrb[8].mxu1 %vm146_vm0, %v495_v12 }
  0x28   :  { %458 = vmatprep.mubr.msk.bf16.mxu0 %vm146_vm0, %v496_v13  ;;  %474 = vmatprep.mubr.msk.bf16.mxu1 %vm146_vm0, %v497_v14 }
  0x2f   :  { %459 = vmatmul.mubr.msk.bf16.gmra.mrb[12].mxu0 %vm146_vm0, %v498_v15  ;;  %475 = vmatmul.mubr.msk.bf16.gmra.mrb[12].mxu1 %vm146_vm0, %v499_v16 }
  0xea   :  { %v448_v17 = vpop.f32.mrb[0].mxu0  ;;  %v464_v18 = vpop.f32.mrb[0].mxu1 }
  0xeb   :  { %359 = vst.msk [vmem:[%s748_s2 + $0x10] sm:$0xff] %vm356_vm1, %v448_v17  ;;  %375 = vst.msk [vmem:[%s748_s2 + $0x90] sm:$0xff] %vm356_vm1, %v464_v18  ;;  %v229_v19 = vpop.f32.mrb[1].mxu0  ;;  %v293_v20 = vpop.f32.mrb[1].mxu1 }
  0xec   :  { %357 = vst.msk [vmem:[%s748_s2] sm:$0xff] %vm356_vm1, %v229_v19  ;;  %373 = vst.msk [vmem:[%s748_s2 + $0x80] sm:$0xff] %vm356_vm1, %v293_v20  ;;  %v449_v21 = vpop.f32.mrb[2].mxu0  ;;  %v465_v22 = vpop.f32.mrb[2].mxu1 }
  0xed   :  { %360 = vst.msk [vmem:[%s748_s2 + $0x18] sm:$0xff] %vm356_vm1, %v449_v21  ;;  %376 = vst.msk [vmem:[%s748_s2 + $0x98] sm:$0xff] %vm356_vm1, %v465_v22  ;;  %v232_v23 = vpop.f32.mrb[3].mxu0  ;;  %v296_v24 = vpop.f32.mrb[3].mxu1 }
  0xee   :  { %358 = vst.msk [vmem:[%s748_s2 + $0x8] sm:$0xff] %vm356_vm1, %v232_v23  ;;  %374 = vst.msk [vmem:[%s748_s2 + $0x88] sm:$0xff] %vm356_vm1, %v296_v24 }
  0xf2   :  { %v452_v25 = vpop.f32.mrb[4].mxu0  ;;  %v468_v26 = vpop.f32.mrb[4].mxu1 }
  0xf3   :  { %363 = vst.msk [vmem:[%s748_s2 + $0x30] sm:$0xff] %vm356_vm1, %v452_v25  ;;  %379 = vst.msk [vmem:[%s748_s2 + $0xb0] sm:$0xff] %vm356_vm1, %v468_v26  ;;  %v245_v27 = vpop.f32.mrb[5].mxu0  ;;  %v309_v28 = vpop.f32.mrb[5].mxu1 }
  0xf4   :  { %361 = vst.msk [vmem:[%s748_s2 + $0x20] sm:$0xff] %vm356_vm1, %v245_v27  ;;  %377 = vst.msk [vmem:[%s748_s2 + $0xa0] sm:$0xff] %vm356_vm1, %v309_v28  ;;  %v453_v29 = vpop.f32.mrb[6].mxu0  ;;  %v469_v30 = vpop.f32.mrb[6].mxu1 }
  0xf5   :  { %364 = vst.msk [vmem:[%s748_s2 + $0x38] sm:$0xff] %vm356_vm1, %v453_v29  ;;  %380 = vst.msk [vmem:[%s748_s2 + $0xb8] sm:$0xff] %vm356_vm1, %v469_v30  ;;  %v248_v31 = vpop.f32.mrb[7].mxu0  ;;  %v312_v32 = vpop.f32.mrb[7].mxu1 }
  0xf6   :  { %362 = vst.msk [vmem:[%s748_s2 + $0x28] sm:$0xff] %vm356_vm1, %v248_v31  ;;  %378 = vst.msk [vmem:[%s748_s2 + $0xa8] sm:$0xff] %vm356_vm1, %v312_v32 }
  0xfa   :  { %v456_v33 = vpop.f32.mrb[8].mxu0  ;;  %v472_v34 = vpop.f32.mrb[8].mxu1 }
  0xfb   :  { %367 = vst.msk [vmem:[%s748_s2 + $0x50] sm:$0xff] %vm356_vm1, %v456_v33  ;;  %383 = vst.msk [vmem:[%s748_s2 + $0xd0] sm:$0xff] %vm356_vm1, %v472_v34  ;;  %v261_v35 = vpop.f32.mrb[9].mxu0  ;;  %v325_v36 = vpop.f32.mrb[9].mxu1 }
  0xfc   :  { %365 = vst.msk [vmem:[%s748_s2 + $0x40] sm:$0xff] %vm356_vm1, %v261_v35  ;;  %381 = vst.msk [vmem:[%s748_s2 + $0xc0] sm:$0xff] %vm356_vm1, %v325_v36  ;;  %v457_v37 = vpop.f32.mrb[10].mxu0  ;;  %v473_v38 = vpop.f32.mrb[10].mxu1 }
  0xfd   :  { %368 = vst.msk [vmem:[%s748_s2 + $0x58] sm:$0xff] %vm356_vm1, %v457_v37  ;;  %384 = vst.msk [vmem:[%s748_s2 + $0xd8] sm:$0xff] %vm356_vm1, %v473_v38  ;;  %v264_v39 = vpop.f32.mrb[11].mxu0  ;;  %v328_v40 = vpop.f32.mrb[11].mxu1 }
  0xfe   :  { %366 = vst.msk [vmem:[%s748_s2 + $0x48] sm:$0xff] %vm356_vm1, %v264_v39  ;;  %382 = vst.msk [vmem:[%s748_s2 + $0xc8] sm:$0xff] %vm356_vm1, %v328_v40 }
 0x102   :  { %v460_v41 = vpop.f32.mrb[12].mxu0  ;;  %v476_v42 = vpop.f32.mrb[12].mxu1 }
 0x103   :  { %371 = vst.msk [vmem:[%s748_s2 + $0x70] sm:$0xff] %vm356_vm1, %v460_v41  ;;  %387 = vst.msk [vmem:[%s748_s2 + $0xf0] sm:$0xff] %vm356_vm1, %v476_v42  ;;  %v277_v43 = vpop.f32.mrb[13].mxu0  ;;  %v341_v44 = vpop.f32.mrb[13].mxu1 }
 0x104   :  { %369 = vst.msk [vmem:[%s748_s2 + $0x60] sm:$0xff] %vm356_vm1, %v277_v43  ;;  %385 = vst.msk [vmem:[%s748_s2 + $0xe0] sm:$0xff] %vm356_vm1, %v341_v44  ;;  %v461_v45 = vpop.f32.mrb[14].mxu0  ;;  %v477_v46 = vpop.f32.mrb[14].mxu1 }
 0x105   :  { %372 = vst.msk [vmem:[%s748_s2 + $0x78] sm:$0xff] %vm356_vm1, %v461_v45  ;;  %388 = vst.msk [vmem:[%s748_s2 + $0xf8] sm:$0xff] %vm356_vm1, %v477_v46  ;;  %v280_v47 = vpop.f32.mrb[15].mxu0  ;;  %v344_v48 = vpop.f32.mrb[15].mxu1 }
 0x106   :  { %370 = vst.msk [vmem:[%s748_s2 + $0x68] sm:$0xff] %vm356_vm1, %v280_v47  ;;  %386 = vst.msk [vmem:[%s748_s2 + $0xe8] sm:$0xff] %vm356_vm1, %v344_v48 }
 0x107   :  { %393 = vsyncpa [#allocation3], 1 }

// kernel: tile.28
= control target key start
LH: loop header
LB: loop body
LE: loop exit
PB: predicated region body
PF: predicated region fallthrough
CT: control target
= control target key end

     0   :  { %s28_s0 = inlined_call_operand.vmem [shape: f32[8], index: 0, kind: input, shape index: {}]   ;;  %s29_s1 = inlined_call_operand.vmem [shape: f32[16,8], index: 1, kind: output, shape index: {}]  }
   0x1   :  { %v4_v0 = vld [vmem:[%s28_s0] ss:$0 sm:$0xff] }
   0x2   :  { %5 = vst [vmem:[%s29_s1] sm:$0xff] %v4_v0  ;;  %8 = vst [vmem:[%s29_s1 + $0x8] sm:$0xff] %v4_v0 }

// kernel: tile.29
= control target key start
LH: loop header
LB: loop body
LE: loop exit
PB: predicated region body
PF: predicated region fallthrough
CT: control target
= control target key end

     0   :  { %s131_s10 = smov 120   ;;  %s132_s11 = smov 104   ;;  %vm3_vm0 = vcmask 64512   ;;  %vm9_vm1 = vcmask 1048512   ;;  %vm15_vm2 = vcmask 982912   ;;  %vm21_vm3 = vcmask 917312   ;;  %s207_s0 = inlined_call_operand.vmem [shape: f32[16,8], index: 0, kind: input, shape index: {}]   ;;  %s208_s1 = inlined_call_operand.vmem [shape: f32[1,128], index: 1, kind: output, shape index: {}]  }
   0x1   :  { %v101_v0 = vld [vmem:[%s207_s0 + $0xf] sm:$0x1]   ;;  %v103_v1 = vld [vmem:[%s207_s0 + $0xd] sm:$0x1]   ;;  %v102_v2 = vld [vmem:[%s207_s0 + $0xe] sm:$0x1]  }
   0x2   :  { %7 = vrot.lane.b32.xlu0 %v101_v0, %s131_s10  ;;  %19 = vrot.lane.b32.xlu1 %v103_v1, %s132_s11  ;;  %v104_v3 = vld [vmem:[%s207_s0 + $0xc] sm:$0x1]   ;;  %s133_s16 = smov 112   ;;  %s134_s17 = smov 96   ;;  %v105_v4 = vld [vmem:[%s207_s0 + $0xb] sm:$0x1]  }
   0x3   :  { %v106_v5 = vld [vmem:[%s207_s0 + $0xa] sm:$0x1]   ;;  %v2_v6 = vld [vmem:[%s207_s0] sm:$0x1]   ;;  %s135_s24 = smov 88   ;;  %s136_s25 = smov 80  }
   0x4   :  { %4 = vst.msk [vmem:[#allocation0] sm:$0x1] %vm3_vm0, %v2_v6   ;;  %v107_v7 = vld [vmem:[%s207_s0 + $0x9] sm:$0x1]   ;;  %v108_v8 = vld [vmem:[%s207_s0 + $0x8] sm:$0x1]  }
   0x5   :  { %s137_s30 = smov 72   ;;  %s138_s2 = smov 64   ;;  %v109_v9 = vld [vmem:[%s207_s0 + $0x7] sm:$0x1]   ;;  %v110_v10 = vld [vmem:[%s207_s0 + $0x6] sm:$0x1]  }
   0x6   :  { %13 = vrot.lane.b32.xlu0 %v102_v2, %s133_s16  ;;  %25 = vrot.lane.b32.xlu1 %v104_v3, %s134_s17  ;;  %s139_s7 = smov 56   ;;  %s140_s8 = smov 48   ;;  %v111_v11 = vld [vmem:[%s207_s0 + $0x5] sm:$0x1]   ;;  %v112_v12 = vld [vmem:[%s207_s0 + $0x4] sm:$0x1]  }
   0x7   :  { %s141_s13 = smov 40   ;;  %s142_s14 = smov 32   ;;  %v113_v13 = vld [vmem:[%s207_s0 + $0x3] sm:$0x1]   ;;  %v114_v14 = vld [vmem:[%s207_s0 + $0x2] sm:$0x1]  }
   0x8   :  { %s143_s19 = smov 24   ;;  %s144_s20 = smov 16   ;;  %v115_v15 = vld [vmem:[%s207_s0 + $0x1] sm:$0x1]   ;;  %vm27_vm4 = vcmask 851712   ;;  %vm33_vm5 = vcmask 786112  }
   0x9   :  { %s145_s0 = smov 8   ;;  %vm39_vm6 = vcmask 720512   ;;  %vm45_vm7 = vcmask 654912   ;;  %vm51_vm8 = vcmask 589312   ;;  %vm57_vm9 = vcmask 523712  }
   0xa   :  { %31 = vrot.lane.b32.xlu0 %v105_v4, %s135_s24  ;;  %37 = vrot.lane.b32.xlu1 %v106_v5, %s136_s25  ;;  %vm63_vm10 = vcmask 458112   ;;  %vm69_vm11 = vcmask 392512   ;;  %vm75_vm12 = vcmask 326912   ;;  %vm81_vm13 = vcmask 261312  }
   0xb   :  { %vm87_vm14 = vcmask 195712   ;;  %vm93_vm15 = vcmask 130112  }
   0xe   :  { %43 = vrot.lane.b32.xlu0 %v107_v7, %s137_s30  ;;  %49 = vrot.lane.b32.xlu1 %v108_v8, %s138_s2 }
  0x12   :  { %55 = vrot.lane.b32.xlu0 %v109_v9, %s139_s7  ;;  %61 = vrot.lane.b32.xlu1 %v110_v10, %s140_s8 }
  0x16   :  { %67 = vrot.lane.b32.xlu0 %v111_v11, %s141_s13  ;;  %73 = vrot.lane.b32.xlu1 %v112_v12, %s142_s14 }
  0x1a   :  { %79 = vrot.lane.b32.xlu0 %v113_v13, %s143_s19  ;;  %85 = vrot.lane.b32.xlu1 %v114_v14, %s144_s20 }
  0x1e   :  { %91 = vrot.lane.b32.xlu0 %v115_v15, %s145_s0 }
  0x74   :  { %v8_v16 = vpop.permute.xlu0 %7   ;;  %v20_v17 = vpop.permute.xlu1 %19  }
  0x75   :  { %10 = vst.msk [vmem:[#allocation0] sm:$0x1] %vm9_vm1, %v8_v16  }
  0x78   :  { %v14_v18 = vpop.permute.xlu0 %13   ;;  %v26_v19 = vpop.permute.xlu1 %25  }
  0x79   :  { %16 = vst.msk [vmem:[#allocation0] sm:$0x1] %vm15_vm2, %v14_v18  }
  0x7a   :  { %22 = vst.msk [vmem:[#allocation0] sm:$0x1] %vm21_vm3, %v20_v17  }
  0x7b   :  { %28 = vst.msk [vmem:[#allocation0] sm:$0x1] %vm27_vm4, %v26_v19  }
  0x7c   :  { %v32_v20 = vpop.permute.xlu0 %31   ;;  %v38_v21 = vpop.permute.xlu1 %37  }
  0x7d   :  { %34 = vst.msk [vmem:[#allocation0] sm:$0x1] %vm33_vm5, %v32_v20  }
  0x7e   :  { %40 = vst.msk [vmem:[#allocation0] sm:$0x1] %vm39_vm6, %v38_v21  }
  0x80   :  { %v44_v22 = vpop.permute.xlu0 %43   ;;  %v50_v23 = vpop.permute.xlu1 %49  }
  0x81   :  { %46 = vst.msk [vmem:[#allocation0] sm:$0x1] %vm45_vm7, %v44_v22  }
  0x82   :  { %52 = vst.msk [vmem:[#allocation0] sm:$0x1] %vm51_vm8, %v50_v23  }
  0x84   :  { %v56_v24 = vpop.permute.xlu0 %55   ;;  %v62_v25 = vpop.permute.xlu1 %61  }
  0x85   :  { %58 = vst.msk [vmem:[#allocation0] sm:$0x1] %vm57_vm9, %v56_v24  }
  0x86   :  { %64 = vst.msk [vmem:[#allocation0] sm:$0x1] %vm63_vm10, %v62_v25  }
  0x88   :  { %v68_v26 = vpop.permute.xlu0 %67   ;;  %v74_v27 = vpop.permute.xlu1 %73  }
  0x89   :  { %70 = vst.msk [vmem:[#allocation0] sm:$0x1] %vm69_vm11, %v68_v26  }
  0x8a   :  { %76 = vst.msk [vmem:[#allocation0] sm:$0x1] %vm75_vm12, %v74_v27  }
  0x8c   :  { %v80_v28 = vpop.permute.xlu0 %79   ;;  %v86_v29 = vpop.permute.xlu1 %85  }
  0x8d   :  { %82 = vst.msk [vmem:[#allocation0] sm:$0x1] %vm81_vm13, %v80_v28  }
  0x8e   :  { %88 = vst.msk [vmem:[#allocation0] sm:$0x1] %vm87_vm14, %v86_v29  }
  0x90   :  { %v92_v30 = vpop.permute.xlu0 %91  }
  0x91   :  { %94 = vst.msk [vmem:[#allocation0] sm:$0x1] %vm93_vm15, %v92_v30  }
  0x98   :  { %v98_v31 = vld [vmem:[#allocation0] sm:$0x1] }
  0x99   :  { %100 = vst [vmem:[%s208_s1] sm:$0x1] %v98_v31 }

// kernel: dec_by_layer_apply.7
= control target key start
LH: loop header
LB: loop body
LE: loop exit
PB: predicated region body
PF: predicated region fallthrough
CT: control target
= control target key end

     0   :  { %s235_s9 = smov 0   ;;  %s267_s0 = inlined_call_operand.vmem [shape: f32[32,128], index: 0, kind: input, shape index: {}]   ;;  %s268_s1 = inlined_call_operand.vmem [shape: f32[1,128], index: 1, kind: output, shape index: {0}]   ;;  %s269_s2 = inlined_call_operand.vmem [shape: f32[1,128], index: 2, kind: output, shape index: {1}]  }
   0x1 LB: > { %s193_s10 = sadd.s32 4294967295, %s217_s9   ;;  %p196_p0 = scmp.ge.s32.totalorder %s217_s9, 1  ;;  %s217_s9 = sphi %s235_s9, %s13_s9  }
   0x2   : > { %p106_p1 = scmp.lt.s32.totalorder %s217_s9, 3 }
   0x4   : > { %p107_p2 = pnand %p196_p0, %p106_p1 }
   0x5   : > { %s197_s11 = sshll.u32 (!%p107_p2), %s193_s10, 1  ;;  %p199_p4 = scmp.ne.s32.totalorder (!%p107_p2), %s193_s10, 0 }
   0x6   : > { %110 = sbr.rel (%p107_p2) target bundleno = 40 (0x28), region = 24  ;;  %p124_p3 = scmp.lt.s32.totalorder (!%p107_p2), %s197_s11, 3 }
   0xd   : > { %s271_s11 = smov (!%p124_p3, %s197_s11), 3  ;;  %132 = sbr.rel (%p199_p4) target bundleno = 20 (0x14), region = 28 }
   0xe   : > { %s198_s12 = sshll.u32 %s271_s11, 3  ;;  %v219_v0 = vmov (!%p199_p4), 0.0  }
   0xf   : > { %s127_s15 = scalar_lea.vmem %s267_s0, %s198_s12  ;;  %133 = vst [vmem:[%s268_s1] sm:$0x1] (!%p199_p4), %v219_v0  ;;  %134 = vst [vmem:[%s269_s2] sm:$0x1] (!%p199_p4), %v219_v0 }
  0x14 PF: > { %v135_v1 = vld [vmem:[%s127_s15] sm:$0xff]  ;;  %v136_v2 = vld [vmem:[%s127_s15 + $0x8] sm:$0xff] }
  0x15   : > { %v138_v3 = vadd.f32 %v136_v2, %v135_v1  ;;  %v148_v4 = vmul.f32 %v135_v1, %v135_v1  ;;  %v149_v5 = vmul.f32 %v136_v2, %v136_v2 }
  0x16   : > { %v137_v16 = vld [vmem:[%s268_s1] sm:$0x1] }
  0x17   : > { %v139_v6 = vrot.slane %v138_v3, 4  ;;  %v150_v7 = vadd.f32 %v149_v5, %v148_v4  ;;  %v147_v19 = vld [vmem:[%s269_s2] sm:$0x1] }
  0x19   : > { %v140_v8 = vadd.f32 %v139_v6, %v138_v3  ;;  %v151_v9 = vrot.slane %v150_v7, 4 }
  0x1b   : > { %v141_v10 = vrot.slane %v140_v8, 2  ;;  %v152_v11 = vadd.f32 %v151_v9, %v150_v7 }
  0x1d   : > { %v142_v12 = vadd.f32 %v141_v10, %v140_v8  ;;  %v153_v13 = vrot.slane %v152_v11, 2 }
  0x1f   : > { %v143_v14 = vrot.slane %v142_v12, 1  ;;  %v154_v15 = vadd.f32 %v153_v13, %v152_v11 }
  0x21   : > { %v144_v17 = vadd.f32 %v143_v14, %v142_v12  ;;  %v155_v18 = vrot.slane %v154_v15, 1 }
  0x23   : > { %v145_v20 = vadd.f32 %v144_v17, %v137_v16  ;;  %v156_v21 = vadd.f32 %v155_v18, %v154_v15 }
  0x25   : > { %146 = vst [vmem:[%s268_s1] sm:$0x1] %v145_v20  ;;  %v157_v22 = vadd.f32 %v156_v21, %v147_v19 }
  0x27   : > { %158 = vst [vmem:[%s269_s2] sm:$0x1] %v157_v22 }
  0x28 PF: > { %s13_s9 = sadd.s32 1, %s217_s9  }
  0x29   : > { %p10_p5 = scmp.ge.s32.totalorder %s13_s9, 4  }
  0x2b   :  { %12 = sbr.rel (!%p10_p5) target bundleno = 1 (0x1), region = 62 }

// kernel: dec_by_layer_apply.8
= control target key start
LH: loop header
LB: loop body
LE: loop exit
PB: predicated region body
PF: predicated region fallthrough
CT: control target
= control target key end

     0   :  { %s324_s12 = smov 0   ;;  %s347_s0 = inlined_call_operand.vmem [shape: f32[32,128], index: 0, kind: input, shape index: {}]   ;;  %s348_s1 = inlined_call_operand.vmem [shape: f32[1,128], index: 1, kind: input, shape index: {}]   ;;  %s349_s2 = inlined_call_operand.vmem [shape: f32[1,128], index: 2, kind: input, shape index: {}]   ;;  %s350_s3 = inlined_call_operand.vmem [shape: bf16[32,128], index: 3, kind: output, shape index: {}]  }
   0x1 LB: > { %s266_s13 = sadd.s32 4294967295, %s302_s12   ;;  %p270_p0 = scmp.ge.s32.totalorder %s302_s12, 1  ;;  %s302_s12 = sphi %s324_s12, %s13_s12  }
   0x2   : > { %p138_p1 = scmp.lt.s32.totalorder %s302_s12, 3 }
   0x4   : > { %p139_p2 = pnand %p270_p0, %p138_p1 }
   0x5   : > { %s271_s14 = sshll.u32 (!%p139_p2), %s266_s13, 1  ;;  %v275_v0 = vld [vmem:[%s348_s1] ss:$0 sm:$0xff] (!%p139_p2) }
   0x6   : > { %142 = sbr.rel (%p139_p2) target bundleno = 27 (0x1b), region = 32  ;;  %p163_p3 = scmp.lt.s32.totalorder (!%p139_p2), %s271_s14, 3  ;;  %v276_v3 = vld [vmem:[%s349_s2] ss:$0 sm:$0xff] (!%p139_p2) }
   0xd   : > { %s352_s14 = smov (!%p163_p3, %s271_s14), 3 }
   0xe   : > { %s272_s15 = sshll.u32 %s352_s14, 3  ;;  %s274_s23 = sshll.u32 %s352_s14, 2 }
   0xf   : > { %s166_s20 = scalar_lea.vmem %s347_s0, %s272_s15  ;;  %s172_s26 = scalar_lea.vmem %s350_s3, %s274_s23 }
  0x10   : > { %v174_v1 = vld [vmem:[%s166_s20] sm:$0xff]  ;;  %v175_v2 = vld [vmem:[%s166_s20 + $0x8] sm:$0xff] }
  0x11   : > { %v183_v4 = vmul.f32 %v275_v0, %v174_v1  ;;  %v184_v5 = vmul.f32 %v275_v0, %v175_v2 }
  0x13   : > { %v192_v6 = vadd.f32 %v276_v3, %v183_v4  ;;  %v193_v7 = vadd.f32 %v276_v3, %v184_v5 }
  0x15   : > { %vm194_vm0 = vcmp.gt.f32.partialorder %v192_v6, 0.0  ;;  %vm195_vm1 = vcmp.gt.f32.partialorder %v193_v7, 0.0  ;;  %v196_v8 = vmul.f32 0.3, %v192_v6  ;;  %v197_v9 = vmul.f32 0.3, %v193_v7 }
  0x17   : > { %v198_v10 = vsel %vm194_vm0, %v192_v6, %v196_v8  ;;  %v199_v11 = vsel %vm195_vm1, %v193_v7, %v197_v9 }
  0x18   : > { %v286_v12 = vpack.c.bf16 %v199_v11, %v198_v10 }
  0x1a   : > { %287 = vst [vmem:[%s172_s26] sm:$0xff] %v286_v12  }
  0x1b PF: > { %s13_s12 = sadd.s32 1, %s302_s12  }
  0x1c   : > { %p10_p4 = scmp.ge.s32.totalorder %s13_s12, 4  }
  0x1e   :  { %12 = sbr.rel (!%p10_p4) target bundleno = 1 (0x1), region = 62 }

// kernel: dec_by_layer_apply.9
= control target key start
LH: loop header
LB: loop body
LE: loop exit
PB: predicated region body
PF: predicated region fallthrough
CT: control target
= control target key end

     0   :  { %s933_s9 = smov 0   ;;  %s1108_s0 = inlined_call_operand.vmem [shape: bf16[768,32], index: 0, kind: input, shape index: {}]   ;;  %s1109_s1 = inlined_call_operand.vmem [shape: bf16[32,12], index: 1, kind: input, shape index: {}]   ;;  %s1110_s2 = inlined_call_operand.vmem [shape: f32[768,12], index: 2, kind: output, shape index: {}]  }
   0x1 LB: > { %s735_s10 = sadd.s32 4294967295, %s916_s9   ;;  %p739_p0 = scmp.ge.s32.totalorder %s916_s9, 1  ;;  %s916_s9 = sphi %s933_s9, %s12_s9  }
   0x2   : > { %p113_p1 = scmp.lt.s32.totalorder %s916_s9, 3 }
   0x4   : > { %p114_p2 = pnand %p739_p0, %p113_p1 }
   0x5   : > { %v884_v0 = vld [vmem:[%s1109_s1] sm:$0xff] (!%p114_p2)   ;;  %s135_s13 = smul.u32 (!%p114_p2), 48, %s735_s10  ;;  %v885_v1 = vld [vmem:[%s1109_s1 + $0x8] sm:$0xff] (!%p114_p2)   ;;  %vm332_vm0 = vcmask (!%p114_p2), 261120   ;;  %vm630_vm1 = vcmask (!%p114_p2), 97280  }
   0x6   : > { %117 = sbr.rel (%p114_p2) target bundleno = 275 (0x113), region = 28  ;;  %820 = vmatprep.subr.bf16.mxu0 (!%p114_p2), %v884_v0  ;;  %872 = vmatprep.subr.bf16.mxu1 (!%p114_p2), %v884_v0 }
   0x7   : > { %p136_p3 = scmp.lt.s32.totalorder (!%p114_p2), %s135_s13, 95  ;;  %821 = vmatpush3.bf16.msra.mxu0 (!%p114_p2), %v884_v0  ;;  %874 = vmatpush3.bf16.msra.mxu1 (!%p114_p2), %v884_v0 }
   0x8   : > { %822 = vmatprep.subr.bf16.mxu0 (!%p114_p2), %v885_v1  ;;  %873 = vmatprep.subr.bf16.mxu1 (!%p114_p2), %v885_v1 }
   0xb   : > { %823 = vmatpush3.bf16.msra.mxu0 (!%p114_p2), %v885_v1  ;;  %875 = vmatpush3.bf16.msra.mxu1 (!%p114_p2), %v885_v1 }
   0xd   : > { %s1112_s13 = smov (!%p136_p3, %s135_s13), 95 }
   0xe   : > { %s740_s16 = sshll.u32 %s1112_s13, 2  ;;  %s741_s20 = sshll.u32 %s1112_s13, 3 }
   0xf   : > { %s953_s19 = scalar_lea.vmem %s1108_s0, %s740_s16  ;;  %s1007_s23 = scalar_lea.vmem %s1110_s2, %s741_s20 }
  0x10   : > { %v886_v2 = vld [vmem:[%s953_s19] sm:$0xff]   ;;  %v888_v4 = vld [vmem:[%s953_s19 + $0x8] sm:$0xff]   ;;  %v890_v6 = vld [vmem:[%s953_s19 + $0x10] sm:$0xff]  }
  0x11   : > { %v887_v3 = vld [vmem:[%s953_s19 + $0x60] sm:$0xff]   ;;  %824 = vmatprep.mubr.msk.bf16.mxu0 %vm332_vm0, %v886_v2  ;;  %v889_v5 = vld [vmem:[%s953_s19 + $0x68] sm:$0xff]   ;;  %v891_v7 = vld [vmem:[%s953_s19 + $0x70] sm:$0xff]  }
  0x12   : > { %848 = vmatprep.mubr.msk.bf16.mxu1 %vm332_vm0, %v887_v3  ;;  %825 = vmatmul.mubr.msk.bf16.vlgmr.msra.gmra.mrb[0].mxu0 %vm332_vm0, %v888_v4  ;;  %v892_v8 = vld [vmem:[%s953_s19 + $0x18] sm:$0xff]   ;;  %v894_v10 = vld [vmem:[%s953_s19 + $0x20] sm:$0xff]   ;;  %v896_v12 = vld [vmem:[%s953_s19 + $0x28] sm:$0xff]  }
  0x13   : > { %849 = vmatmul.mubr.msk.bf16.vlgmr.msra.gmra.mrb[0].mxu1 %vm332_vm0, %v889_v5  ;;  %828 = vmatprep.mubr.msk.bf16.mxu0 %vm332_vm0, %v890_v6  ;;  %v893_v9 = vld [vmem:[%s953_s19 + $0x78] sm:$0xff]   ;;  %v895_v11 = vld [vmem:[%s953_s19 + $0x80] sm:$0xff]   ;;  %v897_v13 = vld [vmem:[%s953_s19 + $0x88] sm:$0xff]  }
  0x14   : > { %852 = vmatprep.mubr.msk.bf16.mxu1 %vm332_vm0, %v891_v7  ;;  %v898_v14 = vld [vmem:[%s953_s19 + $0x30] sm:$0xff]   ;;  %v900_v16 = vld [vmem:[%s953_s19 + $0x38] sm:$0xff]   ;;  %v902_v18 = vld [vmem:[%s953_s19 + $0x40] sm:$0xff]  }
  0x15   : > { %v899_v15 = vld [vmem:[%s953_s19 + $0x90] sm:$0xff]   ;;  %v901_v17 = vld [vmem:[%s953_s19 + $0x98] sm:$0xff]   ;;  %v903_v19 = vld [vmem:[%s953_s19 + $0xa0] sm:$0xff]  }
  0x16   : > { %v904_v20 = vld [vmem:[%s953_s19 + $0x48] sm:$0xff]   ;;  %v906_v22 = vld [vmem:[%s953_s19 + $0x50] sm:$0xff]   ;;  %v908_v24 = vld [vmem:[%s953_s19 + $0x58] sm:$0xff]  }
  0x17   : > { %v905_v21 = vld [vmem:[%s953_s19 + $0xa8] sm:$0xff]   ;;  %v907_v23 = vld [vmem:[%s953_s19 + $0xb0] sm:$0xff]   ;;  %v909_v25 = vld [vmem:[%s953_s19 + $0xb8] sm:$0xff]  }
  0x1a   : > { %829 = vmatmul.mubr.msk.bf16.gmra.mrb[4].mxu0 %vm332_vm0, %v892_v8 }
  0x1b   : > { %853 = vmatmul.mubr.msk.bf16.gmra.mrb[4].mxu1 %vm332_vm0, %v893_v9  ;;  %832 = vmatprep.mubr.msk.bf16.mxu0 %vm332_vm0, %v894_v10 }
  0x1c   : > { %856 = vmatprep.mubr.msk.bf16.mxu1 %vm332_vm0, %v895_v11 }
  0x22   : > { %833 = vmatmul.mubr.msk.bf16.gmra.mrb[8].mxu0 %vm332_vm0, %v896_v12 }
  0x23   : > { %857 = vmatmul.mubr.msk.bf16.gmra.mrb[8].mxu1 %vm332_vm0, %v897_v13  ;;  %836 = vmatprep.mubr.msk.bf16.mxu0 %vm332_vm0, %v898_v14 }
  0x24   : > { %860 = vmatprep.mubr.msk.bf16.mxu1 %vm332_vm0, %v899_v15 }
  0x2a   : > { %837 = vmatmul.mubr.msk.bf16.gmra.mrb[12].mxu0 %vm332_vm0, %v900_v16 }
  0x2b   : > { %861 = vmatmul.mubr.msk.bf16.gmra.mrb[12].mxu1 %vm332_vm0, %v901_v17  ;;  %840 = vmatprep.mubr.msk.bf16.mxu0 %vm332_vm0, %v902_v18 }
  0x2c   : > { %864 = vmatprep.mubr.msk.bf16.mxu1 %vm332_vm0, %v903_v19 }
  0x32   : > { %841 = vmatmul.mubr.msk.bf16.gmra.mrb[16].mxu0 %vm332_vm0, %v904_v20 }
  0x33   : > { %865 = vmatmul.mubr.msk.bf16.gmra.mrb[16].mxu1 %vm332_vm0, %v905_v21  ;;  %844 = vmatprep.mubr.msk.bf16.mxu0 %vm332_vm0, %v906_v22 }
  0x34   : > { %868 = vmatprep.mubr.msk.bf16.mxu1 %vm332_vm0, %v907_v23 }
  0x3a   : > { %845 = vmatmul.mubr.msk.bf16.gmra.mrb[20].mxu0 %vm332_vm0, %v908_v24 }
  0x3b   : > { %869 = vmatmul.mubr.msk.bf16.gmra.mrb[20].mxu1 %vm332_vm0, %v909_v25 }
  0xe5   : > { %v826_v26 = vpop.f32.mrb[0].mxu0 }
  0xe6   : > { %633 = vst.msk [vmem:[%s1007_s23 + $0x10] sm:$0xff] %vm630_vm1, %v826_v26  ;;  %v850_v27 = vpop.f32.mrb[0].mxu1  ;;  %v439_v28 = vpop.f32.mrb[1].mxu0 }
  0xe7   : > { %657 = vst.msk [vmem:[%s1007_s23 + $0xd0] sm:$0xff] %vm630_vm1, %v850_v27  ;;  %631 = vst.msk [vmem:[%s1007_s23] sm:$0xff] %vm630_vm1, %v439_v28  ;;  %v535_v29 = vpop.f32.mrb[1].mxu1  ;;  %v827_v30 = vpop.f32.mrb[2].mxu0 }
  0xe8   : > { %655 = vst.msk [vmem:[%s1007_s23 + $0xc0] sm:$0xff] %vm630_vm1, %v535_v29  ;;  %634 = vst.msk [vmem:[%s1007_s23 + $0x18] sm:$0xff] %vm630_vm1, %v827_v30  ;;  %v851_v31 = vpop.f32.mrb[2].mxu1  ;;  %v442_v32 = vpop.f32.mrb[3].mxu0 }
  0xe9   : > { %658 = vst.msk [vmem:[%s1007_s23 + $0xd8] sm:$0xff] %vm630_vm1, %v851_v31  ;;  %632 = vst.msk [vmem:[%s1007_s23 + $0x8] sm:$0xff] %vm630_vm1, %v442_v32  ;;  %v538_v33 = vpop.f32.mrb[3].mxu1 }
  0xea   : > { %656 = vst.msk [vmem:[%s1007_s23 + $0xc8] sm:$0xff] %vm630_vm1, %v538_v33 }
  0xed   : > { %v830_v34 = vpop.f32.mrb[4].mxu0 }
  0xee   : > { %637 = vst.msk [vmem:[%s1007_s23 + $0x30] sm:$0xff] %vm630_vm1, %v830_v34  ;;  %v854_v35 = vpop.f32.mrb[4].mxu1  ;;  %v455_v36 = vpop.f32.mrb[5].mxu0 }
  0xef   : > { %661 = vst.msk [vmem:[%s1007_s23 + $0xf0] sm:$0xff] %vm630_vm1, %v854_v35  ;;  %635 = vst.msk [vmem:[%s1007_s23 + $0x20] sm:$0xff] %vm630_vm1, %v455_v36  ;;  %v551_v37 = vpop.f32.mrb[5].mxu1  ;;  %v831_v38 = vpop.f32.mrb[6].mxu0 }
  0xf0   : > { %659 = vst.msk [vmem:[%s1007_s23 + $0xe0] sm:$0xff] %vm630_vm1, %v551_v37  ;;  %638 = vst.msk [vmem:[%s1007_s23 + $0x38] sm:$0xff] %vm630_vm1, %v831_v38  ;;  %v855_v39 = vpop.f32.mrb[6].mxu1  ;;  %v458_v40 = vpop.f32.mrb[7].mxu0 }
  0xf1   : > { %662 = vst.msk [vmem:[%s1007_s23 + $0xf8] sm:$0xff] %vm630_vm1, %v855_v39  ;;  %636 = vst.msk [vmem:[%s1007_s23 + $0x28] sm:$0xff] %vm630_vm1, %v458_v40  ;;  %v554_v41 = vpop.f32.mrb[7].mxu1 }
  0xf2   : > { %660 = vst.msk [vmem:[%s1007_s23 + $0xe8] sm:$0xff] %vm630_vm1, %v554_v41 }
  0xf5   : > { %v834_v42 = vpop.f32.mrb[8].mxu0 }
  0xf6   : > { %641 = vst.msk [vmem:[%s1007_s23 + $0x50] sm:$0xff] %vm630_vm1, %v834_v42  ;;  %v858_v43 = vpop.f32.mrb[8].mxu1  ;;  %v471_v44 = vpop.f32.mrb[9].mxu0 }
  0xf7   : > { %665 = vst.msk [vmem:[%s1007_s23 + $0x110] sm:$0xff] %vm630_vm1, %v858_v43  ;;  %639 = vst.msk [vmem:[%s1007_s23 + $0x40] sm:$0xff] %vm630_vm1, %v471_v44  ;;  %v567_v45 = vpop.f32.mrb[9].mxu1  ;;  %v835_v46 = vpop.f32.mrb[10].mxu0 }
  0xf8   : > { %663 = vst.msk [vmem:[%s1007_s23 + $0x100] sm:$0xff] %vm630_vm1, %v567_v45  ;;  %642 = vst.msk [vmem:[%s1007_s23 + $0x58] sm:$0xff] %vm630_vm1, %v835_v46  ;;  %v859_v47 = vpop.f32.mrb[10].mxu1  ;;  %v474_v48 = vpop.f32.mrb[11].mxu0 }
  0xf9   : > { %666 = vst.msk [vmem:[%s1007_s23 + $0x118] sm:$0xff] %vm630_vm1, %v859_v47  ;;  %640 = vst.msk [vmem:[%s1007_s23 + $0x48] sm:$0xff] %vm630_vm1, %v474_v48  ;;  %v570_v49 = vpop.f32.mrb[11].mxu1 }
  0xfa   : > { %664 = vst.msk [vmem:[%s1007_s23 + $0x108] sm:$0xff] %vm630_vm1, %v570_v49 }
  0xfd   : > { %v838_v50 = vpop.f32.mrb[12].mxu0 }
  0xfe   : > { %645 = vst.msk [vmem:[%s1007_s23 + $0x70] sm:$0xff] %vm630_vm1, %v838_v50  ;;  %v862_v51 = vpop.f32.mrb[12].mxu1  ;;  %v487_v52 = vpop.f32.mrb[13].mxu0 }
  0xff   : > { %669 = vst.msk [vmem:[%s1007_s23 + $0x130] sm:$0xff] %vm630_vm1, %v862_v51  ;;  %643 = vst.msk [vmem:[%s1007_s23 + $0x60] sm:$0xff] %vm630_vm1, %v487_v52  ;;  %v583_v53 = vpop.f32.mrb[13].mxu1  ;;  %v839_v54 = vpop.f32.mrb[14].mxu0 }
 0x100   : > { %667 = vst.msk [vmem:[%s1007_s23 + $0x120] sm:$0xff] %vm630_vm1, %v583_v53  ;;  %646 = vst.msk [vmem:[%s1007_s23 + $0x78] sm:$0xff] %vm630_vm1, %v839_v54  ;;  %v863_v55 = vpop.f32.mrb[14].mxu1  ;;  %v490_v56 = vpop.f32.mrb[15].mxu0 }
 0x101   : > { %670 = vst.msk [vmem:[%s1007_s23 + $0x138] sm:$0xff] %vm630_vm1, %v863_v55  ;;  %644 = vst.msk [vmem:[%s1007_s23 + $0x68] sm:$0xff] %vm630_vm1, %v490_v56  ;;  %v586_v57 = vpop.f32.mrb[15].mxu1 }
 0x102   : > { %668 = vst.msk [vmem:[%s1007_s23 + $0x128] sm:$0xff] %vm630_vm1, %v586_v57 }
 0x105   : > { %v842_v58 = vpop.f32.mrb[16].mxu0 }
 0x106   : > { %649 = vst.msk [vmem:[%s1007_s23 + $0x90] sm:$0xff] %vm630_vm1, %v842_v58  ;;  %v866_v59 = vpop.f32.mrb[16].mxu1  ;;  %v503_v60 = vpop.f32.mrb[17].mxu0 }
 0x107   : > { %673 = vst.msk [vmem:[%s1007_s23 + $0x150] sm:$0xff] %vm630_vm1, %v866_v59  ;;  %647 = vst.msk [vmem:[%s1007_s23 + $0x80] sm:$0xff] %vm630_vm1, %v503_v60  ;;  %v599_v61 = vpop.f32.mrb[17].mxu1  ;;  %v843_v62 = vpop.f32.mrb[18].mxu0 }
 0x108   : > { %671 = vst.msk [vmem:[%s1007_s23 + $0x140] sm:$0xff] %vm630_vm1, %v599_v61  ;;  %650 = vst.msk [vmem:[%s1007_s23 + $0x98] sm:$0xff] %vm630_vm1, %v843_v62  ;;  %v867_v63 = vpop.f32.mrb[18].mxu1  ;;  %v506_v0 = vpop.f32.mrb[19].mxu0 }
 0x109   : > { %674 = vst.msk [vmem:[%s1007_s23 + $0x158] sm:$0xff] %vm630_vm1, %v867_v63  ;;  %648 = vst.msk [vmem:[%s1007_s23 + $0x88] sm:$0xff] %vm630_vm1, %v506_v0  ;;  %v602_v1 = vpop.f32.mrb[19].mxu1 }
 0x10a   : > { %672 = vst.msk [vmem:[%s1007_s23 + $0x148] sm:$0xff] %vm630_vm1, %v602_v1 }
 0x10d   : > { %v846_v2 = vpop.f32.mrb[20].mxu0 }
 0x10e   : > { %653 = vst.msk [vmem:[%s1007_s23 + $0xb0] sm:$0xff] %vm630_vm1, %v846_v2  ;;  %v870_v3 = vpop.f32.mrb[20].mxu1  ;;  %v519_v4 = vpop.f32.mrb[21].mxu0 }
 0x10f   : > { %677 = vst.msk [vmem:[%s1007_s23 + $0x170] sm:$0xff] %vm630_vm1, %v870_v3  ;;  %651 = vst.msk [vmem:[%s1007_s23 + $0xa0] sm:$0xff] %vm630_vm1, %v519_v4  ;;  %v615_v5 = vpop.f32.mrb[21].mxu1  ;;  %v847_v6 = vpop.f32.mrb[22].mxu0 }
 0x110   : > { %675 = vst.msk [vmem:[%s1007_s23 + $0x160] sm:$0xff] %vm630_vm1, %v615_v5  ;;  %654 = vst.msk [vmem:[%s1007_s23 + $0xb8] sm:$0xff] %vm630_vm1, %v847_v6  ;;  %v871_v7 = vpop.f32.mrb[22].mxu1  ;;  %v522_v8 = vpop.f32.mrb[23].mxu0 }
 0x111   : > { %678 = vst.msk [vmem:[%s1007_s23 + $0x178] sm:$0xff] %vm630_vm1, %v871_v7  ;;  %652 = vst.msk [vmem:[%s1007_s23 + $0xa8] sm:$0xff] %vm630_vm1, %v522_v8  ;;  %v618_v9 = vpop.f32.mrb[23].mxu1 }
 0x112   : > { %676 = vst.msk [vmem:[%s1007_s23 + $0x168] sm:$0xff] %vm630_vm1, %v618_v9 }
 0x113 PF: > { %s12_s9 = sadd.s32 1, %s916_s9  }
 0x114   : > { %p9_p4 = scmp.ge.s32.totalorder %s12_s9, 4  }
 0x116   :  { %11 = sbr.rel (!%p9_p4) target bundleno = 1 (0x1), region = 58 }

// kernel: dec_by_layer_apply.10
= control target key start
LH: loop header
LB: loop body
LE: loop exit
PB: predicated region body
PF: predicated region fallthrough
CT: control target
= control target key end

     0   :  { %v14_v0 = vlaneseq  ;;  %v148_v10 = vmov 0.0   ;;  %v149_v21 = vmov 1966171168   ;;  %s213_s0 = inlined_call_operand.vmem [shape: f32[16,384], index: 0, kind: input, shape index: {}]   ;;  %s214_s1 = inlined_call_operand.vmem [shape: f32[1,384], index: 1, kind: output, shape index: {0}]   ;;  %s215_s2 = inlined_call_operand.vmem [shape: f32[1,384], index: 2, kind: output, shape index: {1}]  }
   0x1   :  { %v20_v1 = vld [vmem:[%s213_s0] sm:$0xff]  ;;  %v21_v2 = vld [vmem:[%s213_s0 + $0x8] sm:$0xff]  ;;  %v22_v3 = vld [vmem:[%s213_s0 + $0x10] sm:$0xff]  ;;  %v53_v22 = vunpack.c.l.s4 %v149_v21 }
   0x2   :  { %vm174_vm0 = vcmp.lt.s32.totalorder %v14_v0, 384  ;;  %v23_v5 = vld [vmem:[%s213_s0 + $0x18] sm:$0xff]  ;;  %v24_v6 = vld [vmem:[%s213_s0 + $0x20] sm:$0xff]  ;;  %v25_v7 = vld [vmem:[%s213_s0 + $0x28] sm:$0xff]  ;;  %v82_v8 = vmul.f32 %v20_v1, %v20_v1  ;;  %v83_v9 = vmul.f32 %v21_v2, %v21_v2  ;;  %v84_v14 = vmul.f32 %v22_v3, %v22_v3 }
   0x3   :  { %18 = vst.msk [vmem:[%s214_s1] sm:$0x7] %vm174_vm0, %v148_v10  ;;  %v27_v11 = vadd.f32 %v23_v5, %v20_v1  ;;  %v34_v12 = vadd.f32 %v24_v6, %v21_v2  ;;  %v41_v13 = vadd.f32 %v25_v7, %v22_v3  ;;  %19 = vst.msk [vmem:[%s215_s2] sm:$0x7] %vm174_vm0, %v148_v10  ;;  %v56_v29 = vshrl.u32 %v14_v0, 7 }
   0x4   :  { %v85_v15 = vmul.f32 %v23_v5, %v23_v5  ;;  %v86_v16 = vmul.f32 %v24_v6, %v24_v6  ;;  %v87_v17 = vmul.f32 %v25_v7, %v25_v7  ;;  %v54_v36 = vunpack.c.0.s8 %v53_v22 }
   0x5   :  { %v28_v18 = vrot.slane %v27_v11, 4  ;;  %v35_v19 = vrot.slane %v34_v12, 4  ;;  %v42_v20 = vrot.slane %v41_v13, 4 }
   0x6   :  { %v88_v23 = vadd.f32 %v85_v15, %v82_v8  ;;  %v95_v24 = vadd.f32 %v86_v16, %v83_v9  ;;  %v102_v25 = vadd.f32 %v87_v17, %v84_v14  ;;  %v57_v49 = vsub.s32 %v54_v36, %v56_v29 }
   0x7   :  { %v29_v26 = vadd.f32 %v28_v18, %v27_v11  ;;  %v36_v27 = vadd.f32 %v35_v19, %v34_v12  ;;  %v43_v28 = vadd.f32 %v42_v20, %v41_v13 }
   0x8   :  { %v89_v30 = vrot.slane %v88_v23, 4  ;;  %v96_v31 = vrot.slane %v95_v24, 4  ;;  %v103_v32 = vrot.slane %v102_v25, 4 }
   0x9   :  { %v30_v33 = vrot.slane %v29_v26, 2  ;;  %v37_v34 = vrot.slane %v36_v27, 2  ;;  %v44_v35 = vrot.slane %v43_v28, 2 }
   0xa   :  { %v90_v37 = vadd.f32 %v89_v30, %v88_v23  ;;  %v97_v38 = vadd.f32 %v96_v31, %v95_v24  ;;  %v104_v39 = vadd.f32 %v103_v32, %v102_v25  ;;  %v26_v5 = vld [vmem:[%s214_s1] sm:$0x7] }
   0xb   :  { %v31_v40 = vadd.f32 %v30_v33, %v29_v26  ;;  %v38_v41 = vadd.f32 %v37_v34, %v36_v27  ;;  %v45_v42 = vadd.f32 %v44_v35, %v43_v28  ;;  %v81_v10 = vld [vmem:[%s215_s2] sm:$0x7] }
   0xc   :  { %v91_v43 = vrot.slane %v90_v37, 2  ;;  %v98_v44 = vrot.slane %v97_v38, 2  ;;  %v105_v45 = vrot.slane %v104_v39, 2 }
   0xd   :  { %v32_v46 = vrot.slane %v31_v40, 1  ;;  %v39_v47 = vrot.slane %v38_v41, 1  ;;  %v46_v48 = vrot.slane %v45_v42, 1 }
   0xe   :  { %v92_v50 = vadd.f32 %v91_v43, %v90_v37  ;;  %v99_v51 = vadd.f32 %v98_v44, %v97_v38  ;;  %v106_v52 = vadd.f32 %v105_v45, %v104_v39 }
   0xf   :  { %v33_v53 = vadd.f32 %v32_v46, %v31_v40  ;;  %v40_v54 = vadd.f32 %v39_v47, %v38_v41  ;;  %v47_v55 = vadd.f32 %v46_v48, %v45_v42 }
  0x10   :  { %v93_v56 = vrot.slane %v92_v50, 1  ;;  %v100_v57 = vrot.slane %v99_v51, 1  ;;  %v107_v58 = vrot.slane %v106_v52, 1 }
  0x11   :  { %v51_v59 = vcombine.low %v33_v53, %v40_v54  ;;  %v65_v60 = vrot.slane %v47_v55, %v57_v49 }
  0x12   :  { %v94_v61 = vadd.f32 %v93_v56, %v92_v50  ;;  %v101_v62 = vadd.f32 %v100_v57, %v99_v51  ;;  %v108_v63 = vadd.f32 %v107_v58, %v106_v52 }
  0x13   :  { %v58_v0 = vrot.slane %v51_v59, %v57_v49 }
  0x14   :  { %v112_v1 = vcombine.low %v94_v61, %v101_v62  ;;  %v126_v2 = vrot.slane %v108_v63, %v57_v49 }
  0x15   :  { %v66_v3 = vcombine.low %v58_v0, %v65_v60 }
  0x16   :  { %v119_v6 = vrot.slane %v112_v1, %v57_v49 }
  0x17   :  { %v73_v7 = vrot.slane %v66_v3, %v57_v49 }
  0x18   :  { %v127_v8 = vcombine.low %v119_v6, %v126_v2 }
  0x19   :  { %v75_v9 = vadd.f32 %v73_v7, %v26_v5 }
  0x1a   :  { %v134_v11 = vrot.slane %v127_v8, %v57_v49 }
  0x1b   :  { %80 = vst.msk [vmem:[%s214_s1] sm:$0x7] %vm174_vm0, %v75_v9 }
  0x1c   :  { %v136_v12 = vadd.f32 %v134_v11, %v81_v10 }
  0x1e   :  { %137 = vst.msk [vmem:[%s215_s2] sm:$0x7] %vm174_vm0, %v136_v12 }

// kernel: tile.38
= control target key start
LH: loop header
LB: loop body
LE: loop exit
PB: predicated region body
PF: predicated region fallthrough
CT: control target
= control target key end

     0   :  { %s112_s0 = inlined_call_operand.vmem [shape: f32[3], index: 0, kind: input, shape index: {}]   ;;  %s113_s1 = inlined_call_operand.vmem [shape: f32[128,3], index: 1, kind: output, shape index: {}]  }
   0x1   :  { %v4_v0 = vld [vmem:[%s112_s0] ss:$0 sm:$0xff] }
   0x2   :  { %5 = vst [vmem:[%s113_s1] sm:$0xff] %v4_v0  ;;  %36 = vst [vmem:[%s113_s1 + $0x8] sm:$0xff] %v4_v0 }
   0x3   :  { %37 = vst [vmem:[%s113_s1 + $0x10] sm:$0xff] %v4_v0  ;;  %38 = vst [vmem:[%s113_s1 + $0x18] sm:$0xff] %v4_v0 }
   0x4   :  { %39 = vst [vmem:[%s113_s1 + $0x20] sm:$0xff] %v4_v0  ;;  %40 = vst [vmem:[%s113_s1 + $0x28] sm:$0xff] %v4_v0 }
   0x5   :  { %41 = vst [vmem:[%s113_s1 + $0x30] sm:$0xff] %v4_v0  ;;  %42 = vst [vmem:[%s113_s1 + $0x38] sm:$0xff] %v4_v0 }
   0x6   :  { %43 = vst [vmem:[%s113_s1 + $0x40] sm:$0xff] %v4_v0  ;;  %44 = vst [vmem:[%s113_s1 + $0x48] sm:$0xff] %v4_v0 }
   0x7   :  { %45 = vst [vmem:[%s113_s1 + $0x50] sm:$0xff] %v4_v0  ;;  %46 = vst [vmem:[%s113_s1 + $0x58] sm:$0xff] %v4_v0 }
   0x8   :  { %47 = vst [vmem:[%s113_s1 + $0x60] sm:$0xff] %v4_v0  ;;  %48 = vst [vmem:[%s113_s1 + $0x68] sm:$0xff] %v4_v0 }
   0x9   :  { %49 = vst [vmem:[%s113_s1 + $0x70] sm:$0xff] %v4_v0  ;;  %50 = vst [vmem:[%s113_s1 + $0x78] sm:$0xff] %v4_v0 }

// kernel: tile.39
= control target key start
LH: loop header
LB: loop body
LE: loop exit
PB: predicated region body
PF: predicated region fallthrough
CT: control target
= control target key end

     0   :  { %vm9_vm0 = vcmask 7168   ;;  %vm13_vm1 = vcmask 15360   ;;  %s1142_s14 = smov 127   ;;  %s1143_s15 = smov 125   ;;  %vm3_vm2 = vcmask 23552   ;;  %vm16_vm3 = vcmask 1048568   ;;  %s1682_s0 = inlined_call_operand.vmem [shape: f32[128,3], index: 0, kind: input, shape index: {}]   ;;  %s1683_s1 = inlined_call_operand.vmem [shape: f32[1,384], index: 1, kind: output, shape index: {}]  }
   0x1   :  { %v884_v0 = vld [vmem:[%s1682_s0 + $0x55] sm:$0x1]   ;;  %v888_v3 = vld [vmem:[%s1682_s0 + $0x7f] sm:$0x1]   ;;  %v886_v4 = vld [vmem:[%s1682_s0 + $0x2a] sm:$0x1]  }
   0x2   :  { %v885_v1 = vld [vmem:[%s1682_s0 + $0x55] sm:$0x1]   ;;  %34 = vrot.lane.b32.xlu1 %v888_v3, %s1143_s15  ;;  %v887_v5 = vld [vmem:[%s1682_s0 + $0x2a] sm:$0x1]   ;;  %v889_v7 = vld [vmem:[%s1682_s0 + $0x54] sm:$0x1]  }
   0x3   :  { %v10_v2 = vsel %vm9_vm0, %v885_v1, %v884_v0  ;;  %v24_v6 = vsel %vm13_vm1, %v887_v5, %v886_v4  ;;  %s1144_s20 = smov 126   ;;  %s1145_s21 = smov 124   ;;  %v890_v8 = vld [vmem:[%s1682_s0 + $0x29] sm:$0x1]   ;;  %v891_v9 = vld [vmem:[%s1682_s0 + $0x7e] sm:$0x1]  }
   0x4   :  { %11 = vrot.lane.b32.xlu0 %v10_v2, %s1142_s14  ;;  %s1146_s26 = smov 123   ;;  %s1147_s27 = smov 122   ;;  %v892_v10 = vld [vmem:[%s1682_s0 + $0x53] sm:$0x1]   ;;  %v893_v11 = vld [vmem:[%s1682_s0 + $0x28] sm:$0x1]  }
   0x5   :  { %s1148_s3 = smov 121   ;;  %s1149_s4 = smov 120   ;;  %v894_v12 = vld [vmem:[%s1682_s0 + $0x7d] sm:$0x1]   ;;  %v895_v13 = vld [vmem:[%s1682_s0 + $0x52] sm:$0x1]  }
   0x6   :  { %41 = vrot.lane.b32.xlu1 %v889_v7, %s1145_s21  ;;  %s1150_s9 = smov 119   ;;  %s1151_s10 = smov 118   ;;  %v896_v14 = vld [vmem:[%s1682_s0 + $0x27] sm:$0x1]   ;;  %v897_v15 = vld [vmem:[%s1682_s0 + $0x7c] sm:$0x1]  }
   0x7   :  { %s1152_s15 = smov 117   ;;  %s1153_s16 = smov 116   ;;  %v898_v16 = vld [vmem:[%s1682_s0 + $0x51] sm:$0x1]   ;;  %v899_v17 = vld [vmem:[%s1682_s0 + $0x26] sm:$0x1]  }
   0x8   :  { %25 = vrot.lane.b32.xlu0 %v24_v6, %s1144_s20  ;;  %s1154_s21 = smov 115   ;;  %s1155_s22 = smov 114   ;;  %v900_v18 = vld [vmem:[%s1682_s0 + $0x7b] sm:$0x1]   ;;  %v901_v19 = vld [vmem:[%s1682_s0 + $0x50] sm:$0x1]  }
   0x9   :  { %s1157_s28 = smov 112   ;;  %v902_v20 = vld [vmem:[%s1682_s0 + $0x25] sm:$0x1]   ;;  %v903_v21 = vld [vmem:[%s1682_s0 + $0x7a] sm:$0x1]   ;;  %s1158_s6 = smov 111  }
   0xa   :  { %54 = vrot.lane.b32.xlu1 %v891_v9, %s1147_s27  ;;  %s1156_s27 = smov 113   ;;  %v2_v22 = vld [vmem:[%s1682_s0] sm:$0x1]   ;;  %s1159_s7 = smov 110   ;;  %v904_v23 = vld [vmem:[%s1682_s0 + $0x4f] sm:$0x1]  }
   0xb   :  { %4 = vst.msk [vmem:[#allocation0] sm:$0x1] %vm3_vm2, %v2_v22   ;;  %v905_v24 = vld [vmem:[%s1682_s0 + $0x24] sm:$0x1]   ;;  %s1160_s12 = smov 109   ;;  %s1161_s13 = smov 108  }
   0xc   :  { %48 = vrot.lane.b32.xlu0 %v890_v8, %s1146_s26  ;;  %v906_v25 = vld [vmem:[%s1682_s0 + $0x79] sm:$0x1]   ;;  %v907_v26 = vld [vmem:[%s1682_s0 + $0x4e] sm:$0x1]   ;;  %s1162_s18 = smov 107   ;;  %s1163_s19 = smov 106  }
   0xd   :  { %v908_v27 = vld [vmem:[%s1682_s0 + $0x23] sm:$0x1]   ;;  %v909_v28 = vld [vmem:[%s1682_s0 + $0x78] sm:$0x1]   ;;  %s1164_s24 = smov 105   ;;  %s1165_s25 = smov 104  }
   0xe   :  { %68 = vrot.lane.b32.xlu1 %v893_v11, %s1149_s4  ;;  %v910_v29 = vld [vmem:[%s1682_s0 + $0x4d] sm:$0x1]   ;;  %v911_v30 = vld [vmem:[%s1682_s0 + $0x22] sm:$0x1]   ;;  %s1166_s30 = smov 103   ;;  %s1167_s2 = smov 102  }
   0xf   :  { %v912_v31 = vld [vmem:[%s1682_s0 + $0x77] sm:$0x1]   ;;  %v913_v32 = vld [vmem:[%s1682_s0 + $0x4c] sm:$0x1]   ;;  %s1169_s8 = smov 100   ;;  %s1171_s14 = smov 98  }
  0x10   :  { %61 = vrot.lane.b32.xlu0 %v892_v10, %s1148_s3  ;;  %v914_v33 = vld [vmem:[%s1682_s0 + $0x21] sm:$0x1]   ;;  %v915_v34 = vld [vmem:[%s1682_s0 + $0x76] sm:$0x1]   ;;  %v916_v35 = vld [vmem:[%s1682_s0 + $0x4b] sm:$0x1]  }
  0x11   :  { %v917_v36 = vld [vmem:[%s1682_s0 + $0x20] sm:$0x1]   ;;  %s1173_s20 = smov 96   ;;  %v918_v37 = vld [vmem:[%s1682_s0 + $0x75] sm:$0x1]   ;;  %s1175_s26 = smov 94  }
  0x12   :  { %81 = vrot.lane.b32.xlu1 %v895_v13, %s1151_s10  ;;  %v919_v38 = vld [vmem:[%s1682_s0 + $0x4a] sm:$0x1]   ;;  %v920_v39 = vld [vmem:[%s1682_s0 + $0x1f] sm:$0x1]   ;;  %v921_v40 = vld [vmem:[%s1682_s0 + $0x74] sm:$0x1]  }
  0x13   :  { %s1177_s3 = smov 92   ;;  %v922_v41 = vld [vmem:[%s1682_s0 + $0x49] sm:$0x1]   ;;  %v923_v42 = vld [vmem:[%s1682_s0 + $0x1e] sm:$0x1]   ;;  %s1187_s4 = smov 82  }
  0x14   :  { %74 = vrot.lane.b32.xlu0 %v894_v12, %s1150_s9  ;;  %s1179_s9 = smov 90   ;;  %v924_v43 = vld [vmem:[%s1682_s0 + $0x73] sm:$0x1]   ;;  %v925_v44 = vld [vmem:[%s1682_s0 + $0x48] sm:$0x1]   ;;  %s1189_s10 = smov 80  }
  0x15   :  { %v926_v45 = vld [vmem:[%s1682_s0 + $0x1d] sm:$0x1]   ;;  %v927_v46 = vld [vmem:[%s1682_s0 + $0x72] sm:$0x1]   ;;  %v928_v47 = vld [vmem:[%s1682_s0 + $0x47] sm:$0x1]  }
  0x16   :  { %94 = vrot.lane.b32.xlu1 %v897_v15, %s1153_s16  ;;  %v929_v48 = vld [vmem:[%s1682_s0 + $0x1c] sm:$0x1]   ;;  %v930_v49 = vld [vmem:[%s1682_s0 + $0x71] sm:$0x1]   ;;  %v931_v50 = vld [vmem:[%s1682_s0 + $0x46] sm:$0x1]  }
  0x17   :  { %v932_v51 = vld [vmem:[%s1682_s0 + $0x1b] sm:$0x1]   ;;  %v933_v52 = vld [vmem:[%s1682_s0 + $0x70] sm:$0x1]   ;;  %v934_v53 = vld [vmem:[%s1682_s0 + $0x45] sm:$0x1]  }
  0x18   :  { %88 = vrot.lane.b32.xlu0 %v896_v14, %s1152_s15  ;;  %s1181_s15 = smov 88   ;;  %v935_v54 = vld [vmem:[%s1682_s0 + $0x1a] sm:$0x1]   ;;  %s1191_s16 = smov 78   ;;  %v936_v55 = vld [vmem:[%s1682_s0 + $0x6f] sm:$0x1]  }
  0x19   :  { %v937_v56 = vld [vmem:[%s1682_s0 + $0x44] sm:$0x1]   ;;  %v938_v57 = vld [vmem:[%s1682_s0 + $0x19] sm:$0x1]   ;;  %v939_v58 = vld [vmem:[%s1682_s0 + $0x6e] sm:$0x1]  }
  0x1a   :  { %108 = vrot.lane.b32.xlu1 %v899_v17, %s1155_s22  ;;  %s1193_s22 = smov 76   ;;  %v940_v59 = vld [vmem:[%s1682_s0 + $0x43] sm:$0x1]   ;;  %v941_v60 = vld [vmem:[%s1682_s0 + $0x18] sm:$0x1]   ;;  %s1197_s5 = smov 72  }
  0x1b   :  { %v942_v61 = vld [vmem:[%s1682_s0 + $0x6d] sm:$0x1]   ;;  %v943_v62 = vld [vmem:[%s1682_s0 + $0x42] sm:$0x1]   ;;  %s1199_s11 = smov 70   ;;  %vm36_vm4 = vcmask 1048552  }
  0x1c   :  { %101 = vrot.lane.b32.xlu0 %v898_v16, %s1154_s21  ;;  %s1183_s21 = smov 86   ;;  %v944_v63 = vld [vmem:[%s1682_s0 + $0x17] sm:$0x1]   ;;  %v945_v0 = vld [vmem:[%s1682_s0 + $0x6c] sm:$0x1]   ;;  %vm30_vm5 = vcmask 1048560  }
  0x1d   :  { %s1201_s17 = smov 68   ;;  %v946_v3 = vld [vmem:[%s1682_s0 + $0x41] sm:$0x1]   ;;  %vm43_vm6 = vcmask 1040352   ;;  %v947_v4 = vld [vmem:[%s1682_s0 + $0x16] sm:$0x1]  }
  0x1e   :  { %121 = vrot.lane.b32.xlu1 %v901_v19, %s1157_s28  ;;  %s1195_s28 = smov 74   ;;  %vm50_vm7 = vcmask 1032152   ;;  %s1203_s23 = smov 66   ;;  %vm56_vm8 = vcmask 1023952   ;;  %v948_v7 = vld [vmem:[%s1682_s0 + $0x6b] sm:$0x1]  }
  0x1f   :  { %v949_v8 = vld [vmem:[%s1682_s0 + $0x40] sm:$0x1]   ;;  %vm63_vm9 = vcmask 1015752   ;;  %s1205_s29 = smov 64   ;;  %vm70_vm10 = vcmask 1007552   ;;  %vm76_vm11 = vcmask 999352  }
  0x20   :  { %114 = vrot.lane.b32.xlu0 %v900_v18, %s1156_s27  ;;  %s1185_s27 = smov 84   ;;  %v950_v11 = vld [vmem:[%s1682_s0 + $0x15] sm:$0x1]   ;;  %v951_v12 = vld [vmem:[%s1682_s0 + $0x6a] sm:$0x1]   ;;  %vm83_vm12 = vcmask 991152  }
  0x21   :  { %v952_v15 = vld [vmem:[%s1682_s0 + $0x3f] sm:$0x1]   ;;  %v953_v16 = vld [vmem:[%s1682_s0 + $0x14] sm:$0x1]   ;;  %vm90_vm13 = vcmask 982952   ;;  %vm96_vm14 = vcmask 974752  }
  0x22   :  { %134 = vrot.lane.b32.xlu1 %v903_v21, %s1159_s7  ;;  %s1168_s7 = smov 101   ;;  %v954_v19 = vld [vmem:[%s1682_s0 + $0x69] sm:$0x1]   ;;  %vm103_vm15 = vcmask 966552   ;;  %vm123_vm2 = vcmask 941952  }
  0x24   :  { %128 = vrot.lane.b32.xlu0 %v902_v20, %s1158_s6  ;;  %s1207_s6 = smov 62   ;;  %v955_v20 = vld [vmem:[%s1682_s0 + $0x3e] sm:$0x1]  }
  0x26   :  { %148 = vrot.lane.b32.xlu1 %v905_v24, %s1161_s13  ;;  %s1170_s13 = smov 99   ;;  %v957_v24 = vld [vmem:[%s1682_s0 + $0x68] sm:$0x1]  }
  0x28   :  { %141 = vrot.lane.b32.xlu0 %v904_v23, %s1160_s12  ;;  %s1209_s12 = smov 60   ;;  %v956_v23 = vld [vmem:[%s1682_s0 + $0x13] sm:$0x1]  }
  0x2a   :  { %161 = vrot.lane.b32.xlu1 %v907_v26, %s1163_s19  ;;  %s1172_s19 = smov 97  }
  0x2c   :  { %154 = vrot.lane.b32.xlu0 %v906_v25, %s1162_s18  ;;  %s1211_s18 = smov 58  }
  0x2e   :  { %174 = vrot.lane.b32.xlu1 %v909_v28, %s1165_s25  ;;  %s1174_s25 = smov 95   ;;  %v959_v28 = vld [vmem:[%s1682_s0 + $0x12] sm:$0x1]  }
  0x30   :  { %168 = vrot.lane.b32.xlu0 %v908_v27, %s1164_s24  ;;  %s1213_s24 = smov 56   ;;  %v958_v27 = vld [vmem:[%s1682_s0 + $0x3d] sm:$0x1]  }
  0x32   :  { %188 = vrot.lane.b32.xlu1 %v911_v30, %s1167_s2  ;;  %s1176_s2 = smov 93  }
  0x34   :  { %181 = vrot.lane.b32.xlu0 %v910_v29, %s1166_s30  ;;  %s1215_s30 = smov 54  }
  0x36   :  { %201 = vrot.lane.b32.xlu1 %v913_v32, %s1169_s8  ;;  %s1178_s8 = smov 91   ;;  %v961_v32 = vld [vmem:[%s1682_s0 + $0x3c] sm:$0x1]  }
  0x38   :  { %194 = vrot.lane.b32.xlu0 %v912_v31, %s1168_s7  ;;  %v960_v31 = vld [vmem:[%s1682_s0 + $0x67] sm:$0x1]   ;;  %s1217_s7 = smov 52  }
  0x3a   :  { %214 = vrot.lane.b32.xlu1 %v915_v34, %s1171_s14  ;;  %s1180_s14 = smov 89  }
  0x3c   :  { %208 = vrot.lane.b32.xlu0 %v914_v33, %s1170_s13  ;;  %s1219_s13 = smov 50  }
  0x3e   :  { %228 = vrot.lane.b32.xlu1 %v917_v36, %s1173_s20  ;;  %s1182_s20 = smov 87   ;;  %v963_v36 = vld [vmem:[%s1682_s0 + $0x66] sm:$0x1]  }
  0x40   :  { %221 = vrot.lane.b32.xlu0 %v916_v35, %s1172_s19  ;;  %v962_v35 = vld [vmem:[%s1682_s0 + $0x11] sm:$0x1]   ;;  %s1221_s19 = smov 48  }
  0x42   :  { %241 = vrot.lane.b32.xlu1 %v919_v38, %s1175_s26  ;;  %s1184_s26 = smov 85  }
  0x44   :  { %234 = vrot.lane.b32.xlu0 %v918_v37, %s1174_s25  ;;  %s1223_s25 = smov 46  }
  0x46   :  { %254 = vrot.lane.b32.xlu1 %v921_v40, %s1177_s3  ;;  %s1186_s3 = smov 83   ;;  %v965_v40 = vld [vmem:[%s1682_s0 + $0x10] sm:$0x1]  }
  0x48   :  { %248 = vrot.lane.b32.xlu0 %v920_v39, %s1176_s2  ;;  %v964_v39 = vld [vmem:[%s1682_s0 + $0x3b] sm:$0x1]   ;;  %s1225_s2 = smov 44  }
  0x4a   :  { %268 = vrot.lane.b32.xlu1 %v923_v42, %s1179_s9  ;;  %s1188_s9 = smov 81  }
  0x4c   :  { %261 = vrot.lane.b32.xlu0 %v922_v41, %s1178_s8  ;;  %s1227_s8 = smov 42  }
  0x4e   :  { %281 = vrot.lane.b32.xlu1 %v925_v44, %s1181_s15  ;;  %s1190_s15 = smov 79   ;;  %v967_v44 = vld [vmem:[%s1682_s0 + $0x3a] sm:$0x1]  }
  0x50   :  { %274 = vrot.lane.b32.xlu0 %v924_v43, %s1180_s14  ;;  %v966_v43 = vld [vmem:[%s1682_s0 + $0x65] sm:$0x1]   ;;  %s1229_s14 = smov 40  }
  0x52   :  { %294 = vrot.lane.b32.xlu1 %v927_v46, %s1183_s21  ;;  %s1192_s21 = smov 77  }
  0x54   :  { %288 = vrot.lane.b32.xlu0 %v926_v45, %s1182_s20  ;;  %s1231_s20 = smov 38  }
  0x56   :  { %308 = vrot.lane.b32.xlu1 %v929_v48, %s1185_s27  ;;  %s1194_s27 = smov 75   ;;  %v969_v48 = vld [vmem:[%s1682_s0 + $0x64] sm:$0x1]  }
  0x58   :  { %301 = vrot.lane.b32.xlu0 %v928_v47, %s1184_s26  ;;  %v968_v47 = vld [vmem:[%s1682_s0 + $0xf] sm:$0x1]   ;;  %s1233_s26 = smov 36  }
  0x5a   :  { %321 = vrot.lane.b32.xlu1 %v931_v50, %s1187_s4  ;;  %s1196_s4 = smov 73  }
  0x5c   :  { %314 = vrot.lane.b32.xlu0 %v930_v49, %s1186_s3  ;;  %s1235_s3 = smov 34  }
  0x5e   :  { %334 = vrot.lane.b32.xlu1 %v933_v52, %s1189_s10  ;;  %s1198_s10 = smov 71   ;;  %v971_v52 = vld [vmem:[%s1682_s0 + $0xe] sm:$0x1]  }
  0x60   :  { %328 = vrot.lane.b32.xlu0 %v932_v51, %s1188_s9  ;;  %v970_v51 = vld [vmem:[%s1682_s0 + $0x39] sm:$0x1]   ;;  %s1237_s9 = smov 32  }
  0x62   :  { %348 = vrot.lane.b32.xlu1 %v935_v54, %s1191_s16  ;;  %s1200_s16 = smov 69  }
  0x64   :  { %341 = vrot.lane.b32.xlu0 %v934_v53, %s1190_s15  ;;  %s1239_s15 = smov 30  }
  0x66   :  { %361 = vrot.lane.b32.xlu1 %v937_v56, %s1193_s22  ;;  %s1202_s22 = smov 67   ;;  %v973_v56 = vld [vmem:[%s1682_s0 + $0x38] sm:$0x1]  }
  0x68   :  { %354 = vrot.lane.b32.xlu0 %v936_v55, %s1192_s21  ;;  %v972_v55 = vld [vmem:[%s1682_s0 + $0x63] sm:$0x1]   ;;  %s1241_s21 = smov 28  }
  0x6a   :  { %374 = vrot.lane.b32.xlu1 %v939_v58, %s1195_s28  ;;  %s1204_s28 = smov 65  }
  0x6c   :  { %368 = vrot.lane.b32.xlu0 %v938_v57, %s1194_s27  ;;  %s1243_s27 = smov 26  }
  0x6e   :  { %388 = vrot.lane.b32.xlu1 %v941_v60, %s1197_s5  ;;  %s1206_s5 = smov 63   ;;  %v975_v60 = vld [vmem:[%s1682_s0 + $0x62] sm:$0x1]  }
  0x70   :  { %381 = vrot.lane.b32.xlu0 %v940_v59, %s1196_s4  ;;  %v974_v59 = vld [vmem:[%s1682_s0 + $0xd] sm:$0x1]   ;;  %s1245_s4 = smov 24  }
  0x72   :  { %401 = vrot.lane.b32.xlu1 %v943_v62, %s1199_s11  ;;  %s1208_s11 = smov 61  }
  0x74   :  { %394 = vrot.lane.b32.xlu0 %v942_v61, %s1198_s10  ;;  %v35_v2 = vpop.permute.xlu1 %34   ;;  %s1247_s10 = smov 22  }
  0x76   :  { %v12_v1 = vpop.permute.xlu0 %11   ;;  %414 = vrot.lane.b32.xlu1 %v945_v0, %s1201_s17  ;;  %s1210_s17 = smov 59   ;;  %v977_v0 = vld [vmem:[%s1682_s0 + $0xc] sm:$0x1]  }
  0x77   :  { %15 = vst.msk [vmem:[#allocation0 + $0x10] sm:$0x1] %vm13_vm1, %v12_v1   ;;  %vm116_vm1 = vcmask 950152  }
  0x78   :  { %18 = vst.msk [vmem:[#allocation0 + $0x8] sm:$0x1] %vm16_vm3, %v12_v1   ;;  %408 = vrot.lane.b32.xlu0 %v944_v63, %s1200_s16  ;;  %v42_v6 = vpop.permute.xlu1 %41   ;;  %vm130_vm3 = vcmask 933752   ;;  %v976_v63 = vld [vmem:[%s1682_s0 + $0x37] sm:$0x1]   ;;  %s1249_s16 = smov 20  }
  0x79   :  { %38 = vst.msk [vmem:[#allocation0 + $0x10] sm:$0x1] %vm36_vm4, %v35_v2   ;;  %vm136_vm4 = vcmask 925552  }
  0x7a   :  { %v26_v5 = vpop.permute.xlu0 %25   ;;  %428 = vrot.lane.b32.xlu1 %v947_v4, %s1203_s23  ;;  %s1212_s23 = smov 57   ;;  %v979_v4 = vld [vmem:[%s1682_s0 + $0x36] sm:$0x1]  }
  0x7b   :  { %29 = vst.msk [vmem:[#allocation0 + $0x8] sm:$0x1] %vm9_vm0, %v26_v5   ;;  %vm110_vm0 = vcmask 958352  }
  0x7c   :  { %31 = vst.msk [vmem:[#allocation0] sm:$0x1] %vm30_vm5, %v26_v5   ;;  %421 = vrot.lane.b32.xlu0 %v946_v3, %s1202_s22  ;;  %v55_v10 = vpop.permute.xlu1 %54   ;;  %vm143_vm5 = vcmask 917352   ;;  %v978_v3 = vld [vmem:[%s1682_s0 + $0x61] sm:$0x1]   ;;  %s1251_s22 = smov 18  }
  0x7d   :  { %45 = vst.msk [vmem:[#allocation0 + $0x8] sm:$0x1] %vm43_vm6, %v42_v6   ;;  %vm150_vm6 = vcmask 909152  }
  0x7e   :  { %v49_v9 = vpop.permute.xlu0 %48   ;;  %58 = vst.msk [vmem:[#allocation0 + $0x10] sm:$0x1] %vm56_vm8, %v55_v10   ;;  %441 = vrot.lane.b32.xlu1 %v949_v8, %s1205_s29  ;;  %s1214_s29 = smov 55   ;;  %vm163_vm8 = vcmask 892752   ;;  %v981_v8 = vld [vmem:[%s1682_s0 + $0x60] sm:$0x1]  }
  0x7f   :  { %51 = vst.msk [vmem:[#allocation0] sm:$0x1] %vm50_vm7, %v49_v9   ;;  %vm156_vm7 = vcmask 900952  }
  0x80   :  { %434 = vrot.lane.b32.xlu0 %v948_v7, %s1204_s28  ;;  %v69_v14 = vpop.permute.xlu1 %68   ;;  %v980_v7 = vld [vmem:[%s1682_s0 + $0xb] sm:$0x1]   ;;  %s1253_s28 = smov 16  }
  0x81   :  { %71 = vst.msk [vmem:[#allocation0] sm:$0x1] %vm70_vm10, %v69_v14   ;;  %vm176_vm10 = vcmask 876352  }
  0x82   :  { %v62_v13 = vpop.permute.xlu0 %61   ;;  %454 = vrot.lane.b32.xlu1 %v951_v12, %s1207_s6  ;;  %s1216_s6 = smov 53   ;;  %v983_v12 = vld [vmem:[%s1682_s0 + $0xa] sm:$0x1]  }
  0x83   :  { %65 = vst.msk [vmem:[#allocation0 + $0x8] sm:$0x1] %vm63_vm9, %v62_v13   ;;  %vm170_vm9 = vcmask 884552  }
  0x84   :  { %448 = vrot.lane.b32.xlu0 %v950_v11, %s1206_s5  ;;  %v82_v18 = vpop.permute.xlu1 %81   ;;  %v982_v11 = vld [vmem:[%s1682_s0 + $0x35] sm:$0x1]   ;;  %s1255_s5 = smov 14  }
  0x85   :  { %85 = vst.msk [vmem:[#allocation0 + $0x8] sm:$0x1] %vm83_vm12, %v82_v18   ;;  %vm190_vm12 = vcmask 859952  }
  0x86   :  { %v75_v17 = vpop.permute.xlu0 %74   ;;  %468 = vrot.lane.b32.xlu1 %v953_v16, %s1209_s12  ;;  %s1218_s12 = smov 51   ;;  %v985_v16 = vld [vmem:[%s1682_s0 + $0x34] sm:$0x1]  }
  0x87   :  { %78 = vst.msk [vmem:[#allocation0 + $0x10] sm:$0x1] %vm76_vm11, %v75_v17   ;;  %vm183_vm11 = vcmask 868152  }
  0x88   :  { %461 = vrot.lane.b32.xlu0 %v952_v15, %s1208_s11  ;;  %v95_v22 = vpop.permute.xlu1 %94   ;;  %v984_v15 = vld [vmem:[%s1682_s0 + $0x5f] sm:$0x1]   ;;  %s1257_s11 = smov 12  }
  0x89   :  { %98 = vst.msk [vmem:[#allocation0 + $0x10] sm:$0x1] %vm96_vm14, %v95_v22   ;;  %vm203_vm14 = vcmask 843552  }
  0x8a   :  { %v89_v21 = vpop.permute.xlu0 %88   ;;  %481 = vrot.lane.b32.xlu1 %v955_v20, %s1211_s18  ;;  %s1220_s18 = smov 49   ;;  %v987_v20 = vld [vmem:[%s1682_s0 + $0x5e] sm:$0x1]  }
  0x8b   :  { %91 = vst.msk [vmem:[#allocation0] sm:$0x1] %vm90_vm13, %v89_v21   ;;  %vm196_vm13 = vcmask 851752  }
  0x8c   :  { %474 = vrot.lane.b32.xlu0 %v954_v19, %s1210_s17  ;;  %v109_v26 = vpop.permute.xlu1 %108   ;;  %v986_v19 = vld [vmem:[%s1682_s0 + $0x9] sm:$0x1]   ;;  %s1259_s17 = smov 10  }
  0x8d   :  { %111 = vst.msk [vmem:[#allocation0] sm:$0x1] %vm110_vm0, %v109_v26   ;;  %vm216_vm0 = vcmask 827152  }
  0x8e   :  { %v102_v25 = vpop.permute.xlu0 %101   ;;  %494 = vrot.lane.b32.xlu1 %v957_v24, %s1213_s24  ;;  %s1222_s24 = smov 47   ;;  %v989_v24 = vld [vmem:[%s1682_s0 + $0x8] sm:$0x1]  }
  0x8f   :  { %105 = vst.msk [vmem:[#allocation0 + $0x8] sm:$0x1] %vm103_vm15, %v102_v25   ;;  %vm210_vm15 = vcmask 835352  }
  0x90   :  { %488 = vrot.lane.b32.xlu0 %v956_v23, %s1212_s23  ;;  %v122_v30 = vpop.permute.xlu1 %121   ;;  %v988_v23 = vld [vmem:[%s1682_s0 + $0x33] sm:$0x1]   ;;  %s1261_s23 = smov 8  }
  0x91   :  { %125 = vst.msk [vmem:[#allocation0 + $0x8] sm:$0x1] %vm123_vm2, %v122_v30   ;;  %vm230_vm2 = vcmask 810752  }
  0x92   :  { %v115_v29 = vpop.permute.xlu0 %114   ;;  %508 = vrot.lane.b32.xlu1 %v959_v28, %s1215_s30  ;;  %s1224_s30 = smov 45   ;;  %v991_v28 = vld [vmem:[%s1682_s0 + $0x32] sm:$0x1]  }
  0x93   :  { %118 = vst.msk [vmem:[#allocation0 + $0x10] sm:$0x1] %vm116_vm1, %v115_v29   ;;  %vm223_vm1 = vcmask 818952  }
  0x94   :  { %501 = vrot.lane.b32.xlu0 %v958_v27, %s1214_s29  ;;  %v135_v34 = vpop.permute.xlu1 %134   ;;  %v990_v27 = vld [vmem:[%s1682_s0 + $0x5d] sm:$0x1]   ;;  %s1263_s29 = smov 6  }
  0x95   :  { %138 = vst.msk [vmem:[#allocation0 + $0x10] sm:$0x1] %vm136_vm4, %v135_v34   ;;  %vm243_vm4 = vcmask 794352  }
  0x96   :  { %v129_v33 = vpop.permute.xlu0 %128   ;;  %521 = vrot.lane.b32.xlu1 %v961_v32, %s1217_s7  ;;  %s1226_s7 = smov 43   ;;  %v993_v32 = vld [vmem:[%s1682_s0 + $0x5c] sm:$0x1]  }
  0x97   :  { %131 = vst.msk [vmem:[#allocation0] sm:$0x1] %vm130_vm3, %v129_v33   ;;  %vm236_vm3 = vcmask 802552  }
  0x98   :  { %514 = vrot.lane.b32.xlu0 %v960_v31, %s1216_s6  ;;  %v149_v38 = vpop.permute.xlu1 %148   ;;  %v992_v31 = vld [vmem:[%s1682_s0 + $0x7] sm:$0x1]   ;;  %s1265_s6 = smov 4  }
  0x99   :  { %151 = vst.msk [vmem:[#allocation0] sm:$0x1] %vm150_vm6, %v149_v38   ;;  %vm256_vm6 = vcmask 777952  }
  0x9a   :  { %v142_v37 = vpop.permute.xlu0 %141   ;;  %534 = vrot.lane.b32.xlu1 %v963_v36, %s1219_s13  ;;  %s1228_s13 = smov 41   ;;  %v995_v36 = vld [vmem:[%s1682_s0 + $0x6] sm:$0x1]  }
  0x9b   :  { %145 = vst.msk [vmem:[#allocation0 + $0x8] sm:$0x1] %vm143_vm5, %v142_v37   ;;  %vm250_vm5 = vcmask 786152  }
  0x9c   :  { %528 = vrot.lane.b32.xlu0 %v962_v35, %s1218_s12  ;;  %v162_v42 = vpop.permute.xlu1 %161   ;;  %v994_v35 = vld [vmem:[%s1682_s0 + $0x31] sm:$0x1]   ;;  %s1267_s12 = smov 2  }
  0x9d   :  { %165 = vst.msk [vmem:[#allocation0 + $0x8] sm:$0x1] %vm163_vm8, %v162_v42   ;;  %vm270_vm8 = vcmask 761552  }
  0x9e   :  { %v155_v41 = vpop.permute.xlu0 %154   ;;  %548 = vrot.lane.b32.xlu1 %v965_v40, %s1221_s19  ;;  %s1230_s19 = smov 39   ;;  %v997_v40 = vld [vmem:[%s1682_s0 + $0x30] sm:$0x1]  }
  0x9f   :  { %158 = vst.msk [vmem:[#allocation0 + $0x10] sm:$0x1] %vm156_vm7, %v155_v41   ;;  %vm263_vm7 = vcmask 769752  }
  0xa0   :  { %541 = vrot.lane.b32.xlu0 %v964_v39, %s1220_s18  ;;  %v175_v46 = vpop.permute.xlu1 %174   ;;  %v996_v39 = vld [vmem:[%s1682_s0 + $0x5b] sm:$0x1]  }
  0xa1   :  { %178 = vst.msk [vmem:[#allocation0 + $0x10] sm:$0x1] %vm176_vm10, %v175_v46   ;;  %vm283_vm10 = vcmask 745152  }
  0xa2   :  { %v169_v45 = vpop.permute.xlu0 %168   ;;  %561 = vrot.lane.b32.xlu1 %v967_v44, %s1223_s25  ;;  %s1232_s25 = smov 37   ;;  %v999_v44 = vld [vmem:[%s1682_s0 + $0x5a] sm:$0x1]  }
  0xa3   :  { %171 = vst.msk [vmem:[#allocation0] sm:$0x1] %vm170_vm9, %v169_v45   ;;  %vm276_vm9 = vcmask 753352  }
  0xa4   :  { %554 = vrot.lane.b32.xlu0 %v966_v43, %s1222_s24  ;;  %v189_v50 = vpop.permute.xlu1 %188   ;;  %v998_v43 = vld [vmem:[%s1682_s0 + $0x5] sm:$0x1]  }
  0xa5   :  { %191 = vst.msk [vmem:[#allocation0] sm:$0x1] %vm190_vm12, %v189_v50   ;;  %vm296_vm12 = vcmask 728752  }
  0xa6   :  { %v182_v49 = vpop.permute.xlu0 %181   ;;  %574 = vrot.lane.b32.xlu1 %v969_v48, %s1225_s2  ;;  %s1234_s2 = smov 35   ;;  %v1001_v48 = vld [vmem:[%s1682_s0 + $0x4] sm:$0x1]  }
  0xa7   :  { %185 = vst.msk [vmem:[#allocation0 + $0x8] sm:$0x1] %vm183_vm11, %v182_v49   ;;  %vm290_vm11 = vcmask 736952  }
  0xa8   :  { %568 = vrot.lane.b32.xlu0 %v968_v47, %s1224_s30  ;;  %v202_v54 = vpop.permute.xlu1 %201   ;;  %v1000_v47 = vld [vmem:[%s1682_s0 + $0x2f] sm:$0x1]  }
  0xa9   :  { %205 = vst.msk [vmem:[#allocation0 + $0x8] sm:$0x1] %vm203_vm14, %v202_v54   ;;  %vm310_vm14 = vcmask 712352  }
  0xaa   :  { %v195_v53 = vpop.permute.xlu0 %194   ;;  %588 = vrot.lane.b32.xlu1 %v971_v52, %s1227_s8  ;;  %s1236_s8 = smov 33   ;;  %v1003_v52 = vld [vmem:[%s1682_s0 + $0x2e] sm:$0x1]  }
  0xab   :  { %198 = vst.msk [vmem:[#allocation0 + $0x10] sm:$0x1] %vm196_vm13, %v195_v53   ;;  %vm303_vm13 = vcmask 720552  }
  0xac   :  { %581 = vrot.lane.b32.xlu0 %v970_v51, %s1226_s7  ;;  %v215_v58 = vpop.permute.xlu1 %214   ;;  %v1002_v51 = vld [vmem:[%s1682_s0 + $0x59] sm:$0x1]  }
  0xad   :  { %218 = vst.msk [vmem:[#allocation0 + $0x10] sm:$0x1] %vm216_vm0, %v215_v58   ;;  %vm323_vm0 = vcmask 695952  }
  0xae   :  { %v209_v57 = vpop.permute.xlu0 %208   ;;  %601 = vrot.lane.b32.xlu1 %v973_v56, %s1229_s14  ;;  %s1238_s14 = smov 31   ;;  %v1005_v56 = vld [vmem:[%s1682_s0 + $0x58] sm:$0x1]  }
  0xaf   :  { %211 = vst.msk [vmem:[#allocation0] sm:$0x1] %vm210_vm15, %v209_v57   ;;  %vm316_vm15 = vcmask 704152  }
  0xb0   :  { %594 = vrot.lane.b32.xlu0 %v972_v55, %s1228_s13  ;;  %v229_v62 = vpop.permute.xlu1 %228   ;;  %v1004_v55 = vld [vmem:[%s1682_s0 + $0x3] sm:$0x1]  }
  0xb1   :  { %231 = vst.msk [vmem:[#allocation0] sm:$0x1] %vm230_vm2, %v229_v62   ;;  %vm336_vm2 = vcmask 679552  }
  0xb2   :  { %v222_v61 = vpop.permute.xlu0 %221   ;;  %614 = vrot.lane.b32.xlu1 %v975_v60, %s1231_s20  ;;  %s1240_s20 = smov 29   ;;  %v1007_v60 = vld [vmem:[%s1682_s0 + $0x2] sm:$0x1]  }
  0xb3   :  { %225 = vst.msk [vmem:[#allocation0 + $0x8] sm:$0x1] %vm223_vm1, %v222_v61   ;;  %vm330_vm1 = vcmask 687752  }
  0xb4   :  { %608 = vrot.lane.b32.xlu0 %v974_v59, %s1230_s19  ;;  %v242_v2 = vpop.permute.xlu1 %241   ;;  %v1006_v59 = vld [vmem:[%s1682_s0 + $0x2d] sm:$0x1]  }
  0xb5   :  { %245 = vst.msk [vmem:[#allocation0 + $0x8] sm:$0x1] %vm243_vm4, %v242_v2   ;;  %vm350_vm4 = vcmask 663152  }
  0xb6   :  { %v235_v1 = vpop.permute.xlu0 %234   ;;  %628 = vrot.lane.b32.xlu1 %v977_v0, %s1233_s26  ;;  %s1242_s26 = smov 27   ;;  %v1009_v0 = vld [vmem:[%s1682_s0 + $0x2c] sm:$0x1]  }
  0xb7   :  { %238 = vst.msk [vmem:[#allocation0 + $0x10] sm:$0x1] %vm236_vm3, %v235_v1   ;;  %vm343_vm3 = vcmask 671352  }
  0xb8   :  { %621 = vrot.lane.b32.xlu0 %v976_v63, %s1232_s25  ;;  %v255_v6 = vpop.permute.xlu1 %254   ;;  %v1008_v63 = vld [vmem:[%s1682_s0 + $0x57] sm:$0x1]  }
  0xb9   :  { %258 = vst.msk [vmem:[#allocation0 + $0x10] sm:$0x1] %vm256_vm6, %v255_v6   ;;  %vm363_vm6 = vcmask 646752  }
  0xba   :  { %v249_v5 = vpop.permute.xlu0 %248   ;;  %641 = vrot.lane.b32.xlu1 %v979_v4, %s1235_s3  ;;  %s1244_s3 = smov 25   ;;  %v1011_v4 = vld [vmem:[%s1682_s0 + $0x56] sm:$0x1]  }
  0xbb   :  { %251 = vst.msk [vmem:[#allocation0] sm:$0x1] %vm250_vm5, %v249_v5   ;;  %vm356_vm5 = vcmask 654952  }
  0xbc   :  { %634 = vrot.lane.b32.xlu0 %v978_v3, %s1234_s2  ;;  %v269_v10 = vpop.permute.xlu1 %268   ;;  %v1010_v3 = vld [vmem:[%s1682_s0 + $0x1] sm:$0x1]  }
  0xbd   :  { %271 = vst.msk [vmem:[#allocation0] sm:$0x1] %vm270_vm8, %v269_v10   ;;  %vm376_vm8 = vcmask 630352  }
  0xbe   :  { %v262_v9 = vpop.permute.xlu0 %261   ;;  %654 = vrot.lane.b32.xlu1 %v981_v8, %s1237_s9  ;;  %s1246_s9 = smov 23  }
  0xbf   :  { %265 = vst.msk [vmem:[#allocation0 + $0x8] sm:$0x1] %vm263_vm7, %v262_v9   ;;  %vm370_vm7 = vcmask 638552  }
  0xc0   :  { %648 = vrot.lane.b32.xlu0 %v980_v7, %s1236_s8  ;;  %v282_v14 = vpop.permute.xlu1 %281   ;;  %v1012_v7 = vld [vmem:[%s1682_s0 + $0x2b] sm:$0x1]   ;;  %s1268_s0 = smov 1  }
  0xc1   :  { %285 = vst.msk [vmem:[#allocation0 + $0x8] sm:$0x1] %vm283_vm10, %v282_v14   ;;  %vm390_vm10 = vcmask 613952  }
  0xc2   :  { %v275_v13 = vpop.permute.xlu0 %274   ;;  %668 = vrot.lane.b32.xlu1 %v983_v12, %s1239_s15  ;;  %s1248_s15 = smov 21  }
  0xc3   :  { %278 = vst.msk [vmem:[#allocation0 + $0x10] sm:$0x1] %vm276_vm9, %v275_v13   ;;  %vm383_vm9 = vcmask 622152  }
  0xc4   :  { %661 = vrot.lane.b32.xlu0 %v982_v11, %s1238_s14  ;;  %v295_v18 = vpop.permute.xlu1 %294  }
  0xc5   :  { %298 = vst.msk [vmem:[#allocation0 + $0x10] sm:$0x1] %vm296_vm12, %v295_v18   ;;  %vm403_vm12 = vcmask 597552  }
  0xc6   :  { %v289_v17 = vpop.permute.xlu0 %288   ;;  %681 = vrot.lane.b32.xlu1 %v985_v16, %s1241_s21  ;;  %s1250_s21 = smov 19  }
  0xc7   :  { %291 = vst.msk [vmem:[#allocation0] sm:$0x1] %vm290_vm11, %v289_v17   ;;  %vm396_vm11 = vcmask 605752  }
  0xc8   :  { %674 = vrot.lane.b32.xlu0 %v984_v15, %s1240_s20  ;;  %v309_v22 = vpop.permute.xlu1 %308  }
  0xc9   :  { %311 = vst.msk [vmem:[#allocation0] sm:$0x1] %vm310_vm14, %v309_v22   ;;  %vm416_vm14 = vcmask 581152  }
  0xca   :  { %v302_v21 = vpop.permute.xlu0 %301   ;;  %694 = vrot.lane.b32.xlu1 %v987_v20, %s1243_s27  ;;  %s1252_s27 = smov 17  }
  0xcb   :  { %305 = vst.msk [vmem:[#allocation0 + $0x8] sm:$0x1] %vm303_vm13, %v302_v21   ;;  %vm410_vm13 = vcmask 589352  }
  0xcc   :  { %688 = vrot.lane.b32.xlu0 %v986_v19, %s1242_s26  ;;  %v322_v26 = vpop.permute.xlu1 %321  }
  0xcd   :  { %325 = vst.msk [vmem:[#allocation0 + $0x8] sm:$0x1] %vm323_vm0, %v322_v26   ;;  %vm430_vm0 = vcmask 564752  }
  0xce   :  { %v315_v25 = vpop.permute.xlu0 %314   ;;  %708 = vrot.lane.b32.xlu1 %v989_v24, %s1245_s4  ;;  %s1254_s4 = smov 15  }
  0xcf   :  { %318 = vst.msk [vmem:[#allocation0 + $0x10] sm:$0x1] %vm316_vm15, %v315_v25   ;;  %vm423_vm15 = vcmask 572952  }
  0xd0   :  { %701 = vrot.lane.b32.xlu0 %v988_v23, %s1244_s3  ;;  %v335_v30 = vpop.permute.xlu1 %334  }
  0xd1   :  { %338 = vst.msk [vmem:[#allocation0 + $0x10] sm:$0x1] %vm336_vm2, %v335_v30   ;;  %vm443_vm2 = vcmask 548352  }
  0xd2   :  { %v329_v29 = vpop.permute.xlu0 %328   ;;  %721 = vrot.lane.b32.xlu1 %v991_v28, %s1247_s10  ;;  %s1256_s10 = smov 13  }
  0xd3   :  { %331 = vst.msk [vmem:[#allocation0] sm:$0x1] %vm330_vm1, %v329_v29   ;;  %vm436_vm1 = vcmask 556552  }
  0xd4   :  { %714 = vrot.lane.b32.xlu0 %v990_v27, %s1246_s9  ;;  %v349_v34 = vpop.permute.xlu1 %348  }
  0xd5   :  { %351 = vst.msk [vmem:[#allocation0] sm:$0x1] %vm350_vm4, %v349_v34   ;;  %vm456_vm4 = vcmask 531952  }
  0xd6   :  { %v342_v33 = vpop.permute.xlu0 %341   ;;  %734 = vrot.lane.b32.xlu1 %v993_v32, %s1249_s16  ;;  %s1258_s16 = smov 11  }
  0xd7   :  { %345 = vst.msk [vmem:[#allocation0 + $0x8] sm:$0x1] %vm343_vm3, %v342_v33   ;;  %vm450_vm3 = vcmask 540152  }
  0xd8   :  { %728 = vrot.lane.b32.xlu0 %v992_v31, %s1248_s15  ;;  %v362_v38 = vpop.permute.xlu1 %361  }
  0xd9   :  { %365 = vst.msk [vmem:[#allocation0 + $0x8] sm:$0x1] %vm363_vm6, %v362_v38   ;;  %vm470_vm6 = vcmask 515552  }
  0xda   :  { %v355_v37 = vpop.permute.xlu0 %354   ;;  %748 = vrot.lane.b32.xlu1 %v995_v36, %s1251_s22  ;;  %s1260_s22 = smov 9  }
  0xdb   :  { %358 = vst.msk [vmem:[#allocation0 + $0x10] sm:$0x1] %vm356_vm5, %v355_v37   ;;  %vm463_vm5 = vcmask 523752  }
  0xdc   :  { %741 = vrot.lane.b32.xlu0 %v994_v35, %s1250_s21  ;;  %v375_v42 = vpop.permute.xlu1 %374  }
  0xdd   :  { %378 = vst.msk [vmem:[#allocation0 + $0x10] sm:$0x1] %vm376_vm8, %v375_v42   ;;  %vm483_vm8 = vcmask 499152  }
  0xde   :  { %v369_v41 = vpop.permute.xlu0 %368   ;;  %761 = vrot.lane.b32.xlu1 %v997_v40, %s1253_s28  ;;  %s1262_s28 = smov 7  }
  0xdf   :  { %371 = vst.msk [vmem:[#allocation0] sm:$0x1] %vm370_vm7, %v369_v41   ;;  %vm476_vm7 = vcmask 507352  }
  0xe0   :  { %754 = vrot.lane.b32.xlu0 %v996_v39, %s1252_s27  ;;  %v389_v46 = vpop.permute.xlu1 %388  }
  0xe1   :  { %391 = vst.msk [vmem:[#allocation0] sm:$0x1] %vm390_vm10, %v389_v46   ;;  %vm496_vm10 = vcmask 482752  }
  0xe2   :  { %v382_v45 = vpop.permute.xlu0 %381   ;;  %774 = vrot.lane.b32.xlu1 %v999_v44, %s1255_s5  ;;  %s1264_s5 = smov 5  }
  0xe3   :  { %385 = vst.msk [vmem:[#allocation0 + $0x8] sm:$0x1] %vm383_vm9, %v382_v45   ;;  %vm490_vm9 = vcmask 490952  }
  0xe4   :  { %768 = vrot.lane.b32.xlu0 %v998_v43, %s1254_s4  ;;  %v402_v50 = vpop.permute.xlu1 %401  }
  0xe5   :  { %405 = vst.msk [vmem:[#allocation0 + $0x8] sm:$0x1] %vm403_vm12, %v402_v50   ;;  %vm510_vm12 = vcmask 466352  }
  0xe6   :  { %v395_v49 = vpop.permute.xlu0 %394   ;;  %788 = vrot.lane.b32.xlu1 %v1001_v48, %s1257_s11  ;;  %s1266_s11 = smov 3  }
  0xe7   :  { %398 = vst.msk [vmem:[#allocation0 + $0x10] sm:$0x1] %vm396_vm11, %v395_v49   ;;  %vm503_vm11 = vcmask 474552  }
  0xe8   :  { %781 = vrot.lane.b32.xlu0 %v1000_v47, %s1256_s10  ;;  %v415_v54 = vpop.permute.xlu1 %414  }
  0xe9   :  { %418 = vst.msk [vmem:[#allocation0 + $0x10] sm:$0x1] %vm416_vm14, %v415_v54   ;;  %vm523_vm14 = vcmask 449952  }
  0xea   :  { %v409_v53 = vpop.permute.xlu0 %408   ;;  %801 = vrot.lane.b32.xlu1 %v1003_v52, %s1259_s17 }
  0xeb   :  { %411 = vst.msk [vmem:[#allocation0] sm:$0x1] %vm410_vm13, %v409_v53   ;;  %vm516_vm13 = vcmask 458152  }
  0xec   :  { %794 = vrot.lane.b32.xlu0 %v1002_v51, %s1258_s16  ;;  %v429_v58 = vpop.permute.xlu1 %428  }
  0xed   :  { %431 = vst.msk [vmem:[#allocation0] sm:$0x1] %vm430_vm0, %v429_v58   ;;  %vm536_vm0 = vcmask 433552  }
  0xee   :  { %v422_v57 = vpop.permute.xlu0 %421   ;;  %814 = vrot.lane.b32.xlu1 %v1005_v56, %s1261_s23 }
  0xef   :  { %425 = vst.msk [vmem:[#allocation0 + $0x8] sm:$0x1] %vm423_vm15, %v422_v57   ;;  %vm530_vm15 = vcmask 441752  }
  0xf0   :  { %808 = vrot.lane.b32.xlu0 %v1004_v55, %s1260_s22  ;;  %v442_v62 = vpop.permute.xlu1 %441  }
  0xf1   :  { %445 = vst.msk [vmem:[#allocation0 + $0x8] sm:$0x1] %vm443_vm2, %v442_v62   ;;  %vm550_vm2 = vcmask 417152  }
  0xf2   :  { %v435_v61 = vpop.permute.xlu0 %434   ;;  %828 = vrot.lane.b32.xlu1 %v1007_v60, %s1263_s29 }
  0xf3   :  { %438 = vst.msk [vmem:[#allocation0 + $0x10] sm:$0x1] %vm436_vm1, %v435_v61   ;;  %vm543_vm1 = vcmask 425352  }
  0xf4   :  { %821 = vrot.lane.b32.xlu0 %v1006_v59, %s1262_s28  ;;  %v455_v2 = vpop.permute.xlu1 %454  }
  0xf5   :  { %458 = vst.msk [vmem:[#allocation0 + $0x10] sm:$0x1] %vm456_vm4, %v455_v2   ;;  %vm563_vm4 = vcmask 400752  }
  0xf6   :  { %v449_v1 = vpop.permute.xlu0 %448   ;;  %841 = vrot.lane.b32.xlu1 %v1009_v0, %s1265_s6 }
  0xf7   :  { %451 = vst.msk [vmem:[#allocation0] sm:$0x1] %vm450_vm3, %v449_v1   ;;  %vm556_vm3 = vcmask 408952  }
  0xf8   :  { %834 = vrot.lane.b32.xlu0 %v1008_v63, %s1264_s5  ;;  %v469_v6 = vpop.permute.xlu1 %468  }
  0xf9   :  { %471 = vst.msk [vmem:[#allocation0] sm:$0x1] %vm470_vm6, %v469_v6   ;;  %vm576_vm6 = vcmask 384352  }
  0xfa   :  { %v462_v5 = vpop.permute.xlu0 %461   ;;  %854 = vrot.lane.b32.xlu1 %v1011_v4, %s1267_s12 }
  0xfb   :  { %465 = vst.msk [vmem:[#allocation0 + $0x8] sm:$0x1] %vm463_vm5, %v462_v5   ;;  %vm570_vm5 = vcmask 392552  }
  0xfc   :  { %848 = vrot.lane.b32.xlu0 %v1010_v3, %s1266_s11  ;;  %v482_v9 = vpop.permute.xlu1 %481  }
  0xfd   :  { %485 = vst.msk [vmem:[#allocation0 + $0x8] sm:$0x1] %vm483_vm8, %v482_v9   ;;  %vm590_vm8 = vcmask 367952  }
  0xfe   :  { %v475_v8 = vpop.permute.xlu0 %474  }
  0xff   :  { %478 = vst.msk [vmem:[#allocation0 + $0x10] sm:$0x1] %vm476_vm7, %v475_v8   ;;  %vm583_vm7 = vcmask 376152  }
 0x100   :  { %861 = vrot.lane.b32.xlu0 %v1012_v7, %s1268_s0  ;;  %v495_v11 = vpop.permute.xlu1 %494  }
 0x101   :  { %498 = vst.msk [vmem:[#allocation0 + $0x10] sm:$0x1] %vm496_vm10, %v495_v11   ;;  %vm603_vm10 = vcmask 351552  }
 0x102   :  { %v489_v10 = vpop.permute.xlu0 %488  }
 0x103   :  { %491 = vst.msk [vmem:[#allocation0] sm:$0x1] %vm490_vm9, %v489_v10   ;;  %vm596_vm9 = vcmask 359752  }
 0x104   :  { %v509_v13 = vpop.permute.xlu1 %508  }
 0x105   :  { %511 = vst.msk [vmem:[#allocation0] sm:$0x1] %vm510_vm12, %v509_v13   ;;  %vm616_vm12 = vcmask 335152  }
 0x106   :  { %v502_v12 = vpop.permute.xlu0 %501  }
 0x107   :  { %505 = vst.msk [vmem:[#allocation0 + $0x8] sm:$0x1] %vm503_vm11, %v502_v12   ;;  %vm610_vm11 = vcmask 343352  }
 0x108   :  { %v522_v15 = vpop.permute.xlu1 %521  }
 0x109   :  { %525 = vst.msk [vmem:[#allocation0 + $0x8] sm:$0x1] %vm523_vm14, %v522_v15   ;;  %vm630_vm14 = vcmask 318752  }
 0x10a   :  { %v515_v14 = vpop.permute.xlu0 %514  }
 0x10b   :  { %518 = vst.msk [vmem:[#allocation0 + $0x10] sm:$0x1] %vm516_vm13, %v515_v14   ;;  %vm623_vm13 = vcmask 326952  }
 0x10c   :  { %v535_v17 = vpop.permute.xlu1 %534  }
 0x10d   :  { %538 = vst.msk [vmem:[#allocation0 + $0x10] sm:$0x1] %vm536_vm0, %v535_v17   ;;  %vm643_vm0 = vcmask 302352  }
 0x10e   :  { %v529_v16 = vpop.permute.xlu0 %528  }
 0x10f   :  { %531 = vst.msk [vmem:[#allocation0] sm:$0x1] %vm530_vm15, %v529_v16   ;;  %vm636_vm15 = vcmask 310552  }
 0x110   :  { %v549_v19 = vpop.permute.xlu1 %548  }
 0x111   :  { %551 = vst.msk [vmem:[#allocation0] sm:$0x1] %vm550_vm2, %v549_v19   ;;  %vm656_vm2 = vcmask 285952  }
 0x112   :  { %v542_v18 = vpop.permute.xlu0 %541  }
 0x113   :  { %545 = vst.msk [vmem:[#allocation0 + $0x8] sm:$0x1] %vm543_vm1, %v542_v18   ;;  %vm650_vm1 = vcmask 294152  }
 0x114   :  { %v562_v21 = vpop.permute.xlu1 %561  }
 0x115   :  { %565 = vst.msk [vmem:[#allocation0 + $0x8] sm:$0x1] %vm563_vm4, %v562_v21   ;;  %vm670_vm4 = vcmask 269552  }
 0x116   :  { %v555_v20 = vpop.permute.xlu0 %554  }
 0x117   :  { %558 = vst.msk [vmem:[#allocation0 + $0x10] sm:$0x1] %vm556_vm3, %v555_v20   ;;  %vm663_vm3 = vcmask 277752  }
 0x118   :  { %v575_v23 = vpop.permute.xlu1 %574  }
 0x119   :  { %578 = vst.msk [vmem:[#allocation0 + $0x10] sm:$0x1] %vm576_vm6, %v575_v23   ;;  %vm683_vm6 = vcmask 253152  }
 0x11a   :  { %v569_v22 = vpop.permute.xlu0 %568  }
 0x11b   :  { %571 = vst.msk [vmem:[#allocation0] sm:$0x1] %vm570_vm5, %v569_v22   ;;  %vm676_vm5 = vcmask 261352  }
 0x11c   :  { %v589_v25 = vpop.permute.xlu1 %588  }
 0x11d   :  { %591 = vst.msk [vmem:[#allocation0] sm:$0x1] %vm590_vm8, %v589_v25   ;;  %vm696_vm8 = vcmask 236752  }
 0x11e   :  { %v582_v24 = vpop.permute.xlu0 %581  }
 0x11f   :  { %585 = vst.msk [vmem:[#allocation0 + $0x8] sm:$0x1] %vm583_vm7, %v582_v24   ;;  %vm690_vm7 = vcmask 244952  }
 0x120   :  { %v602_v27 = vpop.permute.xlu1 %601  }
 0x121   :  { %605 = vst.msk [vmem:[#allocation0 + $0x8] sm:$0x1] %vm603_vm10, %v602_v27   ;;  %vm710_vm10 = vcmask 220352  }
 0x122   :  { %v595_v26 = vpop.permute.xlu0 %594  }
 0x123   :  { %598 = vst.msk [vmem:[#allocation0 + $0x10] sm:$0x1] %vm596_vm9, %v595_v26   ;;  %vm703_vm9 = vcmask 228552  }
 0x124   :  { %v615_v29 = vpop.permute.xlu1 %614  }
 0x125   :  { %618 = vst.msk [vmem:[#allocation0 + $0x10] sm:$0x1] %vm616_vm12, %v615_v29   ;;  %vm723_vm12 = vcmask 203952  }
 0x126   :  { %v609_v28 = vpop.permute.xlu0 %608  }
 0x127   :  { %611 = vst.msk [vmem:[#allocation0] sm:$0x1] %vm610_vm11, %v609_v28   ;;  %vm716_vm11 = vcmask 212152  }
 0x128   :  { %v629_v31 = vpop.permute.xlu1 %628  }
 0x129   :  { %631 = vst.msk [vmem:[#allocation0] sm:$0x1] %vm630_vm14, %v629_v31   ;;  %vm736_vm14 = vcmask 187552  }
 0x12a   :  { %v622_v30 = vpop.permute.xlu0 %621  }
 0x12b   :  { %625 = vst.msk [vmem:[#allocation0 + $0x8] sm:$0x1] %vm623_vm13, %v622_v30   ;;  %vm730_vm13 = vcmask 195752  }
 0x12c   :  { %v642_v33 = vpop.permute.xlu1 %641  }
 0x12d   :  { %645 = vst.msk [vmem:[#allocation0 + $0x8] sm:$0x1] %vm643_vm0, %v642_v33   ;;  %vm750_vm0 = vcmask 171152  }
 0x12e   :  { %v635_v32 = vpop.permute.xlu0 %634  }
 0x12f   :  { %638 = vst.msk [vmem:[#allocation0 + $0x10] sm:$0x1] %vm636_vm15, %v635_v32   ;;  %vm743_vm15 = vcmask 179352  }
 0x130   :  { %v655_v35 = vpop.permute.xlu1 %654  }
 0x131   :  { %658 = vst.msk [vmem:[#allocation0 + $0x10] sm:$0x1] %vm656_vm2, %v655_v35   ;;  %vm763_vm2 = vcmask 154752  }
 0x132   :  { %v649_v34 = vpop.permute.xlu0 %648  }
 0x133   :  { %651 = vst.msk [vmem:[#allocation0] sm:$0x1] %vm650_vm1, %v649_v34   ;;  %vm756_vm1 = vcmask 162952  }
 0x134   :  { %v669_v37 = vpop.permute.xlu1 %668  }
 0x135   :  { %671 = vst.msk [vmem:[#allocation0] sm:$0x1] %vm670_vm4, %v669_v37   ;;  %vm776_vm4 = vcmask 138352  }
 0x136   :  { %v662_v36 = vpop.permute.xlu0 %661  }
 0x137   :  { %665 = vst.msk [vmem:[#allocation0 + $0x8] sm:$0x1] %vm663_vm3, %v662_v36   ;;  %vm770_vm3 = vcmask 146552  }
 0x138   :  { %v682_v39 = vpop.permute.xlu1 %681  }
 0x139   :  { %685 = vst.msk [vmem:[#allocation0 + $0x8] sm:$0x1] %vm683_vm6, %v682_v39   ;;  %vm790_vm6 = vcmask 121952  }
 0x13a   :  { %v675_v38 = vpop.permute.xlu0 %674  }
 0x13b   :  { %678 = vst.msk [vmem:[#allocation0 + $0x10] sm:$0x1] %vm676_vm5, %v675_v38   ;;  %vm783_vm5 = vcmask 130152  }
 0x13c   :  { %v695_v41 = vpop.permute.xlu1 %694  }
 0x13d   :  { %698 = vst.msk [vmem:[#allocation0 + $0x10] sm:$0x1] %vm696_vm8, %v695_v41   ;;  %vm803_vm8 = vcmask 105552  }
 0x13e   :  { %v689_v40 = vpop.permute.xlu0 %688  }
 0x13f   :  { %691 = vst.msk [vmem:[#allocation0] sm:$0x1] %vm690_vm7, %v689_v40   ;;  %vm796_vm7 = vcmask 113752  }
 0x140   :  { %v709_v43 = vpop.permute.xlu1 %708  }
 0x141   :  { %711 = vst.msk [vmem:[#allocation0] sm:$0x1] %vm710_vm10, %v709_v43   ;;  %vm816_vm10 = vcmask 89152  }
 0x142   :  { %v702_v42 = vpop.permute.xlu0 %701  }
 0x143   :  { %705 = vst.msk [vmem:[#allocation0 + $0x8] sm:$0x1] %vm703_vm9, %v702_v42   ;;  %vm810_vm9 = vcmask 97352  }
 0x144   :  { %v722_v45 = vpop.permute.xlu1 %721  }
 0x145   :  { %725 = vst.msk [vmem:[#allocation0 + $0x8] sm:$0x1] %vm723_vm12, %v722_v45   ;;  %vm830_vm12 = vcmask 72752  }
 0x146   :  { %v715_v44 = vpop.permute.xlu0 %714  }
 0x147   :  { %718 = vst.msk [vmem:[#allocation0 + $0x10] sm:$0x1] %vm716_vm11, %v715_v44   ;;  %vm823_vm11 = vcmask 80952  }
 0x148   :  { %v735_v47 = vpop.permute.xlu1 %734  }
 0x149   :  { %738 = vst.msk [vmem:[#allocation0 + $0x10] sm:$0x1] %vm736_vm14, %v735_v47   ;;  %vm843_vm14 = vcmask 56352  }
 0x14a   :  { %v729_v46 = vpop.permute.xlu0 %728  }
 0x14b   :  { %731 = vst.msk [vmem:[#allocation0] sm:$0x1] %vm730_vm13, %v729_v46   ;;  %vm836_vm13 = vcmask 64552  }
 0x14c   :  { %v749_v49 = vpop.permute.xlu1 %748  }
 0x14d   :  { %751 = vst.msk [vmem:[#allocation0] sm:$0x1] %vm750_vm0, %v749_v49   ;;  %vm856_vm0 = vcmask 39952  }
 0x14e   :  { %v742_v48 = vpop.permute.xlu0 %741  }
 0x14f   :  { %745 = vst.msk [vmem:[#allocation0 + $0x8] sm:$0x1] %vm743_vm15, %v742_v48   ;;  %vm850_vm15 = vcmask 48152  }
 0x150   :  { %v762_v51 = vpop.permute.xlu1 %761  }
 0x151   :  { %765 = vst.msk [vmem:[#allocation0 + $0x8] sm:$0x1] %vm763_vm2, %v762_v51  }
 0x152   :  { %v755_v50 = vpop.permute.xlu0 %754  }
 0x153   :  { %758 = vst.msk [vmem:[#allocation0 + $0x10] sm:$0x1] %vm756_vm1, %v755_v50   ;;  %vm863_vm1 = vcmask 31752  }
 0x154   :  { %v775_v53 = vpop.permute.xlu1 %774  }
 0x155   :  { %778 = vst.msk [vmem:[#allocation0 + $0x10] sm:$0x1] %vm776_vm4, %v775_v53  }
 0x156   :  { %v769_v52 = vpop.permute.xlu0 %768  }
 0x157   :  { %771 = vst.msk [vmem:[#allocation0] sm:$0x1] %vm770_vm3, %v769_v52  }
 0x158   :  { %v789_v55 = vpop.permute.xlu1 %788  }
 0x159   :  { %791 = vst.msk [vmem:[#allocation0] sm:$0x1] %vm790_vm6, %v789_v55  }
 0x15a   :  { %v782_v54 = vpop.permute.xlu0 %781  }
 0x15b   :  { %785 = vst.msk [vmem:[#allocation0 + $0x8] sm:$0x1] %vm783_vm5, %v782_v54  }
 0x15c   :  { %v802_v57 = vpop.permute.xlu1 %801  }
 0x15d   :  { %805 = vst.msk [vmem:[#allocation0 + $0x8] sm:$0x1] %vm803_vm8, %v802_v57  }
 0x15e   :  { %v795_v56 = vpop.permute.xlu0 %794  }
 0x15f   :  { %798 = vst.msk [vmem:[#allocation0 + $0x10] sm:$0x1] %vm796_vm7, %v795_v56  }
 0x160   :  { %v815_v59 = vpop.permute.xlu1 %814  }
 0x161   :  { %818 = vst.msk [vmem:[#allocation0 + $0x10] sm:$0x1] %vm816_vm10, %v815_v59  }
 0x162   :  { %v809_v58 = vpop.permute.xlu0 %808  }
 0x163   :  { %811 = vst.msk [vmem:[#allocation0] sm:$0x1] %vm810_vm9, %v809_v58  }
 0x164   :  { %v829_v61 = vpop.permute.xlu1 %828  }
 0x165   :  { %831 = vst.msk [vmem:[#allocation0] sm:$0x1] %vm830_vm12, %v829_v61  }
 0x166   :  { %v822_v60 = vpop.permute.xlu0 %821  }
 0x167   :  { %825 = vst.msk [vmem:[#allocation0 + $0x8] sm:$0x1] %vm823_vm11, %v822_v60  }
 0x168   :  { %v842_v63 = vpop.permute.xlu1 %841  }
 0x169   :  { %845 = vst.msk [vmem:[#allocation0 + $0x8] sm:$0x1] %vm843_vm14, %v842_v63  }
 0x16a   :  { %v835_v62 = vpop.permute.xlu0 %834  }
 0x16b   :  { %838 = vst.msk [vmem:[#allocation0 + $0x10] sm:$0x1] %vm836_vm13, %v835_v62  }
 0x16c   :  { %v855_v1 = vpop.permute.xlu1 %854  }
 0x16d   :  { %858 = vst.msk [vmem:[#allocation0 + $0x10] sm:$0x1] %vm856_vm0, %v855_v1  }
 0x16e   :  { %v849_v0 = vpop.permute.xlu0 %848  }
 0x16f   :  { %851 = vst.msk [vmem:[#allocation0] sm:$0x1] %vm850_vm15, %v849_v0  }
 0x172   :  { %v862_v2 = vpop.permute.xlu0 %861  }
 0x173   :  { %865 = vst.msk [vmem:[#allocation0 + $0x8] sm:$0x1] %vm863_vm1, %v862_v2  }
 0x174   :  { %v878_v4 = vld [vmem:[#allocation0 + $0x10] sm:$0x1] }
 0x175   :  { %1014 = vst [vmem:[%s1683_s1 + $0x2] sm:$0x1] %v878_v4 }
 0x176   :  { %v869_v3 = vld [vmem:[#allocation0] sm:$0x1] }
 0x177   :  { %871 = vst [vmem:[%s1683_s1] sm:$0x1] %v869_v3 }
 0x17a   :  { %v873_v5 = vld [vmem:[#allocation0 + $0x8] sm:$0x1] }
 0x17b   :  { %1013 = vst [vmem:[%s1683_s1 + $0x1] sm:$0x1] %v873_v5 }

// kernel: dec_by_layer_apply.11
= control target key start
LH: loop header
LB: loop body
LE: loop exit
PB: predicated region body
PF: predicated region fallthrough
CT: control target
= control target key end

     0   :  { %v22_v0 = vlaneseq  ;;  %s156_s1 = inlined_call_operand.vmem [shape: f32[1,384], index: 1, kind: input, shape index: {}]   ;;  %s157_s2 = inlined_call_operand.vmem [shape: f32[1,384], index: 2, kind: input, shape index: {}]   ;;  %s158_s0 = inlined_call_operand.vmem [shape: f32[16,384], index: 0, kind: input, shape index: {}]   ;;  %s159_s3 = inlined_call_operand.vmem [shape: f32[16,384], index: 3, kind: output, shape index: {}]  }
   0x1   :  { %v20_v2 = vld [vmem:[%s156_s1] sm:$0x7]  ;;  %v15_v8 = vld [vmem:[%s158_s0 + $0x8] sm:$0xff]  ;;  %v17_v9 = vld [vmem:[%s158_s0 + $0x18] sm:$0xff] }
   0x2   :  { %v23_v1 = vshrl.u32 %v22_v0, 7  ;;  %v43_v3 = vld [vmem:[%s157_s2] sm:$0x7]  ;;  %v16_v15 = vld [vmem:[%s158_s0 + $0x10] sm:$0xff]  ;;  %v19_v16 = vld [vmem:[%s158_s0 + $0x28] sm:$0xff] }
   0x3   :  { %v14_v4 = vld [vmem:[%s158_s0] sm:$0xff] }
   0x4   :  { %v24_v5 = vsub.s32 0, %v23_v1  ;;  %v28_v6 = vsub.s32 1, %v23_v1  ;;  %v32_v7 = vsub.s32 2, %v23_v1  ;;  %v18_v10 = vld [vmem:[%s158_s0 + $0x20] sm:$0xff] }
   0x6   :  { %v25_v11 = vrot.slane %v20_v2, %v24_v5  ;;  %v48_v12 = vrot.slane %v43_v3, %v24_v5  ;;  %v29_v13 = vrot.slane %v20_v2, %v28_v6  ;;  %v52_v14 = vrot.slane %v43_v3, %v28_v6 }
   0x7   :  { %v33_v17 = vrot.slane %v20_v2, %v32_v7  ;;  %v56_v18 = vrot.slane %v43_v3, %v32_v7 }
   0x8   :  { %v37_v19 = vmul.f32 %v25_v11, %v14_v4  ;;  %v38_v20 = vmul.f32 %v29_v13, %v15_v8  ;;  %v40_v21 = vmul.f32 %v25_v11, %v17_v9  ;;  %v41_v22 = vmul.f32 %v29_v13, %v18_v10 }
   0x9   :  { %v39_v23 = vmul.f32 %v33_v17, %v16_v15  ;;  %v42_v24 = vmul.f32 %v33_v17, %v19_v16 }
   0xa   :  { %v60_v25 = vadd.f32 %v48_v12, %v37_v19  ;;  %v61_v26 = vadd.f32 %v52_v14, %v38_v20  ;;  %v63_v27 = vadd.f32 %v48_v12, %v40_v21  ;;  %v64_v28 = vadd.f32 %v52_v14, %v41_v22 }
   0xb   :  { %v62_v29 = vadd.f32 %v56_v18, %v39_v23  ;;  %v65_v30 = vadd.f32 %v56_v18, %v42_v24 }
   0xc   :  { %vm66_vm0 = vcmp.gt.f32.partialorder %v60_v25, 0.0  ;;  %v72_v31 = vmul.f32 0.3, %v60_v25  ;;  %vm67_vm1 = vcmp.gt.f32.partialorder %v61_v26, 0.0  ;;  %v73_v32 = vmul.f32 0.3, %v61_v26 }
   0xd   :  { %vm68_vm2 = vcmp.gt.f32.partialorder %v62_v29, 0.0  ;;  %v74_v33 = vmul.f32 0.3, %v62_v29  ;;  %vm69_vm3 = vcmp.gt.f32.partialorder %v63_v27, 0.0  ;;  %v75_v34 = vmul.f32 0.3, %v63_v27 }
   0xe   :  { %v78_v35 = vsel %vm66_vm0, %v60_v25, %v72_v31  ;;  %v79_v36 = vsel %vm67_vm1, %v61_v26, %v73_v32  ;;  %vm70_vm4 = vcmp.gt.f32.partialorder %v64_v28, 0.0  ;;  %v76_v37 = vmul.f32 0.3, %v64_v28 }
   0xf   :  { %84 = vst [vmem:[%s159_s3] sm:$0xff] %v78_v35  ;;  %85 = vst [vmem:[%s159_s3 + $0x8] sm:$0xff] %v79_v36  ;;  %v80_v38 = vsel %vm68_vm2, %v62_v29, %v74_v33  ;;  %v81_v39 = vsel %vm69_vm3, %v63_v27, %v75_v34  ;;  %vm71_vm5 = vcmp.gt.f32.partialorder %v65_v30, 0.0  ;;  %v77_v40 = vmul.f32 0.3, %v65_v30 }
  0x10   :  { %86 = vst [vmem:[%s159_s3 + $0x10] sm:$0xff] %v80_v38  ;;  %87 = vst [vmem:[%s159_s3 + $0x18] sm:$0xff] %v81_v39  ;;  %v82_v41 = vsel %vm70_vm4, %v64_v28, %v76_v37 }
  0x11   :  { %88 = vst [vmem:[%s159_s3 + $0x20] sm:$0xff] %v82_v41  ;;  %v83_v42 = vsel %vm71_vm5, %v65_v30, %v77_v40 }
  0x12   :  { %89 = vst [vmem:[%s159_s3 + $0x28] sm:$0xff] %v83_v42 }

</bundles_post_ra>
